<compile_context>
chip_gen: v7x
topology: tpu7x:2x2x1
jax: 0.10.0
libtpu: 0.0.40
codegen_flags: <defaults>
</compile_context>

<pallas_src>
import jax
import jax.numpy as jnp
from jax import lax
from jax.experimental import pallas as pl
from jax.experimental.pallas import tpu as pltpu


# ----------------------------- model dims (small) -----------------------------
VOCAB = 32
EMB = 32
HID = 32
B = 2
S_SRC = 8
S_TGT = 8


# --------------------------------- kernel -------------------------------------
def seq2seq_kernel(ids_ref, emb_ref, wih_cat_ref,
                   enc_whh_ref, enc_b_ref,
                   dec_whh_ref, dec_b_ref,
                   fc_w_ref, fc_b_ref,
                   out_ref):
    """Everything resident in VMEM (total footprint well under 100 KB).

    ids_ref:    (N, 1) i32, N = (S+T)*B, time-major rows (row = t*B + b),
                src block first then tgt block.
    emb_ref:    (V, E)           wih_cat_ref: (E, 8H) = [enc_wih | dec_wih]
    enc/dec_whh:(H, 4H)          enc/dec_b:   (1, 4H)
    fc_w: (H, V)  fc_b: (1, V)   out_ref: (B, T, V)
    """
    Bm, T, V = out_ref.shape
    H = enc_whh_ref.shape[0]
    N = ids_ref.shape[0]
    S = N // Bm - T

    # ---- one-hot MXU embedding gather (no scalar loads, no masked row stores) ----
    ids = ids_ref[...]                                                    # (N, 1) i32
    onehot = (ids == lax.broadcasted_iota(jnp.int32, (N, V), 1)).astype(jnp.float32)
    x_all = jnp.dot(onehot, emb_ref[...],
                    preferred_element_type=jnp.float32)                   # (N, E)

    # ---- fused input-to-hidden matmul for both LSTMs (off the serial chain) ----
    gx_all = jnp.dot(x_all, wih_cat_ref[...],
                     preferred_element_type=jnp.float32)                  # (N, 8H)
    gx_src = gx_all[:S * Bm, 0:4 * H] + enc_b_ref[...]                    # (S*B, 4H)
    gx_tgt = gx_all[S * Bm:, 4 * H:8 * H] + dec_b_ref[...]                # (T*B, 4H)

    enc_whh = enc_whh_ref[...]
    dec_whh = dec_whh_ref[...]

    # Pre-scale constant: 0.5 on i/f/o lane blocks, 1.0 on the g block, so one
    # tanh covers all four gates (sigmoid(x) = 0.5*tanh(x/2) + 0.5).
    lane = lax.broadcasted_iota(jnp.int32, (1, 4 * H), 1)
    is_g = jnp.logical_and(lane >= 2 * H, lane < 3 * H)
    pre = jnp.where(is_g, jnp.float32(1.0), jnp.float32(0.5))             # (1, 4H)

    def cell(gx, h, c, whh):
        # gx already holds x@Wih + b; only the recurrent matmul is on the chain.
        gates = gx + jnp.dot(h, whh, preferred_element_type=jnp.float32)  # (B, 4H)
        th = jnp.tanh(gates * pre)                 # single EUP push per cell
        i = 0.5 * th[:, 0 * H:1 * H] + 0.5
        f = 0.5 * th[:, 1 * H:2 * H] + 0.5
        g = th[:, 2 * H:3 * H]
        o = 0.5 * th[:, 3 * H:4 * H] + 0.5
        c_new = f * c + i * g
        h_new = o * jnp.tanh(c_new)
        return h_new, c_new

    # Zero initial state (PyTorch LSTM default); carried in registers.
    h = jnp.zeros((Bm, H), jnp.float32)
    c = jnp.zeros((Bm, H), jnp.float32)

    # -------- encoder: fully unrolled, keep only final (h, c) --------
    for t in range(S):
        h, c = cell(gx_src[t * Bm:(t + 1) * Bm, :], h, c, enc_whh)

    # -------- decoder: init from encoder state, hidden states kept in registers --------
    hs_t = []
    for t in range(T):
        h, c = cell(gx_tgt[t * Bm:(t + 1) * Bm, :], h, c, dec_whh)
        hs_t.append(h)

    # Batch-major row order (row = b*T + t) so the reshape matches (B, T, V).
    hs = jnp.concatenate(
        [hs_t[t][b:b + 1, :] for b in range(Bm) for t in range(T)], axis=0)  # (B*T, H)

    # -------- batched output projection + single batch-first store --------
    logits = (jnp.dot(hs, fc_w_ref[...], preferred_element_type=jnp.float32)
              + fc_b_ref[...])                                             # (B*T, V)
    out_ref[...] = logits.reshape(Bm, T, V).astype(out_ref.dtype)


# -------------------------------- wrapper --------------------------------------
@jax.jit
def totum_seq2seq(src_tokens, tgt_tokens, params):
    """src_tokens, tgt_tokens: int32 (B, S) / (B, T). Returns (B, T, V) f32."""
    emb = params["embedding"]                        # (V, E)
    Vs, E = emb.shape
    Bm, S = src_tokens.shape
    T = tgt_tokens.shape[1]
    H = params["enc_whh"].shape[0]

    # Time-major flattened ids (row = t*B + b), src block then tgt block.
    src_tm = jnp.transpose(src_tokens).reshape(S * Bm, 1)
    tgt_tm = jnp.transpose(tgt_tokens).reshape(T * Bm, 1)
    ids_all = jnp.concatenate([src_tm, tgt_tm], axis=0).astype(jnp.int32)  # (N, 1)

    # Fuse the two input-to-hidden weight matrices along columns: (E, 8H).
    wih_cat = jnp.concatenate([params["enc_wih"], params["dec_wih"]], axis=1)

    vmem = pl.BlockSpec(memory_space=pltpu.MemorySpace.VMEM)

    n_tok = (S + T) * Bm
    flops = (2 * n_tok * Vs * E               # one-hot gather matmul
             + 2 * n_tok * E * 8 * H          # fused ih matmul
             + 2 * n_tok * H * 4 * H          # recurrent matmuls
             + 2 * Bm * T * H * Vs)           # output projection
    cost = pl.CostEstimate(
        flops=flops,
        transcendentals=n_tok * 5 * H,        # tanh(gates) + tanh(c) per cell
        bytes_accessed=4 * (ids_all.size + emb.size + wih_cat.size
                            + 2 * (H * 4 * H + 4 * H)
                            + H * Vs + Vs + Bm * T * Vs))

    return pl.pallas_call(
        seq2seq_kernel,
        out_shape=jax.ShapeDtypeStruct((Bm, T, Vs), jnp.float32),
        in_specs=[vmem] * 9,
        out_specs=vmem,
        cost_estimate=cost,
    )(
        ids_all, emb, wih_cat,
        params["enc_whh"], params["enc_b"],
        params["dec_whh"], params["dec_b"],
        params["fc_w"], params["fc_b"],
    )


# --------------------------- pure-JAX reference --------------------------------
def _lstm_ref(xs_tm, wih, whh, b, h0, c0):
    H = h0.shape[-1]

    def step(carry, x):
        h, c = carry
        g = x @ wih + h @ whh + b
        i = jax.nn.sigmoid(g[:, 0 * H:1 * H])
        f = jax.nn.sigmoid(g[:, 1 * H:2 * H])
        gg = jnp.tanh(g[:, 2 * H:3 * H])
        o = jax.nn.sigmoid(g[:, 3 * H:4 * H])
        c = f * c + i * gg
        h = o * jnp.tanh(c)
        return (h, c), h

    (h, c), hs = lax.scan(step, (h0, c0), xs_tm)
    return hs, h, c


def totum_seq2seq_ref(src_tokens, tgt_tokens, params):
    emb = params["embedding"]
    es = jnp.transpose(jnp.take(emb, src_tokens, axis=0), (1, 0, 2))
    et = jnp.transpose(jnp.take(emb, tgt_tokens, axis=0), (1, 0, 2))
    h0 = jnp.zeros((src_tokens.shape[0], HID), jnp.float32)
    c0 = jnp.zeros_like(h0)
    _, h, c = _lstm_ref(es, params["enc_wih"], params["enc_whh"],
                        params["enc_b"], h0, c0)
    hs, _, _ = _lstm_ref(et, params["dec_wih"], params["dec_whh"],
                         params["dec_b"], h, c)
    logits = hs @ params["fc_w"] + params["fc_b"]    # (T, B, V)
    return jnp.transpose(logits, (1, 0, 2))


# ---------------------------------- main ---------------------------------------
def make_params(key):
    ks = jax.random.split(key, 10)
    scale = 0.1

    def n(k, shape):
        return (scale * jax.random.normal(k, shape)).astype(jnp.float32)

    # PyTorch stores weight_ih (4H, E) / weight_hh (4H, H); we pre-transpose
    # to (E, 4H) / (H, 4H), and fold bias_ih + bias_hh into one (1, 4H) bias.
    return {
        "embedding": n(ks[0], (VOCAB, EMB)),
        "enc_wih": n(ks[1], (EMB, 4 * HID)),
        "enc_whh": n(ks[2], (HID, 4 * HID)),
        "enc_b": n(ks[3], (1, 4 * HID)),
        "dec_wih": n(ks[4], (EMB, 4 * HID)),
        "dec_whh": n(ks[5], (HID, 4 * HID)),
        "dec_b": n(ks[6], (1, 4 * HID)),
        "fc_w": n(ks[7], (HID, VOCAB)),
        "fc_b": n(ks[8], (1, VOCAB)),
    }


if __name__ == "__main__":
    root = jax.random.PRNGKey(0)
    k_par, k_src, k_tgt = jax.random.split(root, 3)

    params = make_params(k_par)
    src = jax.random.randint(k_src, (B, S_SRC), 0, VOCAB, dtype=jnp.int32)
    tgt = jax.random.randint(k_tgt, (B, S_TGT), 0, VOCAB, dtype=jnp.int32)

    pred = jax.block_until_ready(totum_seq2seq(src, tgt, params))
    ref = jax.block_until_ready(totum_seq2seq_ref(src, tgt, params))

    assert pred.shape == (B, S_TGT, VOCAB), pred.shape
    assert jnp.allclose(pred, ref, atol=1e-4, rtol=1e-4), (
        float(jnp.max(jnp.abs(pred - ref))))

    print("KERNEL_OK")
</pallas_src>

<mosaic_0001>
module attributes {stable_mosaic.version = 11 : i64} {
  func.func @seq2seq_kernel(%arg0: memref<32x1xi32, #tpu.memory_space<vmem>>, %arg1: memref<32x32xf32, #tpu.memory_space<vmem>>, %arg2: memref<32x256xf32, #tpu.memory_space<vmem>>, %arg3: memref<32x128xf32, #tpu.memory_space<vmem>>, %arg4: memref<1x128xf32, #tpu.memory_space<vmem>>, %arg5: memref<32x128xf32, #tpu.memory_space<vmem>>, %arg6: memref<1x128xf32, #tpu.memory_space<vmem>>, %arg7: memref<32x32xf32, #tpu.memory_space<vmem>>, %arg8: memref<1x32xf32, #tpu.memory_space<vmem>>, %arg9: memref<2x8x32xf32, #tpu.memory_space<vmem>>) attributes {dimension_semantics = [], scalar_prefetch = 0 : i64, scratch_operands = 0 : i64, tpu.core_type = #tpu.core_type<tc>} {
    %c0 = arith.constant 0 : index
    %c0_0 = arith.constant 0 : index
    %0 = vector.load %arg0[%c0, %c0_0] : memref<32x1xi32, #tpu.memory_space<vmem>>, vector<32x1xi32>
    %1 = tpu.iota {dimensions = array<i32: 1>} : vector<32x32xi32>
    %2 = vector.broadcast %0 : vector<32x1xi32> to vector<32x32xi32>
    %3 = arith.cmpi eq, %2, %1 : vector<32x32xi32>
    %4 = arith.extui %3 : vector<32x32xi1> to vector<32x32xi32>
    %5 = arith.sitofp %4 : vector<32x32xi32> to vector<32x32xf32>
    %c0_1 = arith.constant 0 : index
    %c0_2 = arith.constant 0 : index
    %6 = vector.load %arg1[%c0_1, %c0_2] : memref<32x32xf32, #tpu.memory_space<vmem>>, vector<32x32xf32>
    %cst = arith.constant dense<0.000000e+00> : vector<32x32xf32>
    %7 = tpu.matmul %5, %6, %cst {dimension_numbers = #tpu.dot_dimension_numbers<[1], [0], [0], [1], [0, 0, 1, 1], [], []>} : vector<32x32xf32>, vector<32x32xf32>, vector<32x32xf32> -> vector<32x32xf32>
    %c0_3 = arith.constant 0 : index
    %c0_4 = arith.constant 0 : index
    %8 = vector.load %arg2[%c0_3, %c0_4] : memref<32x256xf32, #tpu.memory_space<vmem>>, vector<32x256xf32>
    %cst_5 = arith.constant dense<0.000000e+00> : vector<32x256xf32>
    %9 = tpu.matmul %7, %8, %cst_5 {dimension_numbers = #tpu.dot_dimension_numbers<[1], [0], [0], [1], [0, 0, 1, 1], [], []>} : vector<32x32xf32>, vector<32x256xf32>, vector<32x256xf32> -> vector<32x256xf32>
    %10 = vector.extract_strided_slice %9 {offsets = [0, 0], sizes = [16, 128], strides = [1, 1]} : vector<32x256xf32> to vector<16x128xf32>
    %c0_6 = arith.constant 0 : index
    %c0_7 = arith.constant 0 : index
    %11 = vector.load %arg4[%c0_6, %c0_7] : memref<1x128xf32, #tpu.memory_space<vmem>>, vector<1x128xf32>
    %12 = vector.broadcast %11 : vector<1x128xf32> to vector<16x128xf32>
    %13 = arith.addf %10, %12 : vector<16x128xf32>
    %14 = vector.extract_strided_slice %9 {offsets = [16, 128], sizes = [16, 128], strides = [1, 1]} : vector<32x256xf32> to vector<16x128xf32>
    %c0_8 = arith.constant 0 : index
    %c0_9 = arith.constant 0 : index
    %15 = vector.load %arg6[%c0_8, %c0_9] : memref<1x128xf32, #tpu.memory_space<vmem>>, vector<1x128xf32>
    %16 = vector.broadcast %15 : vector<1x128xf32> to vector<16x128xf32>
    %17 = arith.addf %14, %16 : vector<16x128xf32>
    %c0_10 = arith.constant 0 : index
    %c0_11 = arith.constant 0 : index
    %18 = vector.load %arg3[%c0_10, %c0_11] : memref<32x128xf32, #tpu.memory_space<vmem>>, vector<32x128xf32>
    %c0_12 = arith.constant 0 : index
    %c0_13 = arith.constant 0 : index
    %19 = vector.load %arg5[%c0_12, %c0_13] : memref<32x128xf32, #tpu.memory_space<vmem>>, vector<32x128xf32>
    %20 = tpu.iota {dimensions = array<i32: 1>} : vector<1x128xi32>
    %c64_i32 = arith.constant 64 : i32
    %21 = vector.broadcast %c64_i32 : i32 to vector<1x128xi32>
    %22 = arith.cmpi sge, %20, %21 : vector<1x128xi32>
    %c96_i32 = arith.constant 96 : i32
    %23 = vector.broadcast %c96_i32 : i32 to vector<1x128xi32>
    %24 = arith.cmpi slt, %20, %23 : vector<1x128xi32>
    %25 = arith.andi %22, %24 : vector<1x128xi1>
    %cst_14 = arith.constant 1.000000e+00 : f32
    %cst_15 = arith.constant 5.000000e-01 : f32
    %26 = vector.broadcast %cst_14 : f32 to vector<1x128xf32>
    %27 = vector.broadcast %cst_15 : f32 to vector<1x128xf32>
    %28 = arith.select %25, %26, %27 : vector<1x128xi1>, vector<1x128xf32>
    %cst_16 = arith.constant 0.000000e+00 : f32
    %29 = vector.broadcast %cst_16 : f32 to vector<2x32xf32>
    %cst_17 = arith.constant 0.000000e+00 : f32
    %30 = vector.broadcast %cst_17 : f32 to vector<2x32xf32>
    %31 = vector.extract_strided_slice %13 {offsets = [0, 0], sizes = [2, 128], strides = [1, 1]} : vector<16x128xf32> to vector<2x128xf32>
    %cst_18 = arith.constant dense<0.000000e+00> : vector<2x128xf32>
    %32 = tpu.matmul %29, %18, %cst_18 {dimension_numbers = #tpu.dot_dimension_numbers<[1], [0], [0], [1], [0, 0, 1, 1], [], []>} : vector<2x32xf32>, vector<32x128xf32>, vector<2x128xf32> -> vector<2x128xf32>
    %33 = arith.addf %31, %32 : vector<2x128xf32>
    %34 = vector.broadcast %28 : vector<1x128xf32> to vector<2x128xf32>
    %35 = arith.mulf %33, %34 : vector<2x128xf32>
    %36 = math.tanh %35 : vector<2x128xf32>
    %37 = vector.extract_strided_slice %36 {offsets = [0, 0], sizes = [2, 32], strides = [1, 1]} : vector<2x128xf32> to vector<2x32xf32>
    %cst_19 = arith.constant 5.000000e-01 : f32
    %38 = vector.broadcast %cst_19 : f32 to vector<2x32xf32>
    %39 = arith.mulf %38, %37 : vector<2x32xf32>
    %cst_20 = arith.constant 5.000000e-01 : f32
    %40 = vector.broadcast %cst_20 : f32 to vector<2x32xf32>
    %41 = arith.addf %39, %40 : vector<2x32xf32>
    %42 = vector.extract_strided_slice %36 {offsets = [0, 32], sizes = [2, 32], strides = [1, 1]} : vector<2x128xf32> to vector<2x32xf32>
    %cst_21 = arith.constant 5.000000e-01 : f32
    %43 = vector.broadcast %cst_21 : f32 to vector<2x32xf32>
    %44 = arith.mulf %43, %42 : vector<2x32xf32>
    %cst_22 = arith.constant 5.000000e-01 : f32
    %45 = vector.broadcast %cst_22 : f32 to vector<2x32xf32>
    %46 = arith.addf %44, %45 : vector<2x32xf32>
    %47 = vector.extract_strided_slice %36 {offsets = [0, 64], sizes = [2, 32], strides = [1, 1]} : vector<2x128xf32> to vector<2x32xf32>
    %48 = vector.extract_strided_slice %36 {offsets = [0, 96], sizes = [2, 32], strides = [1, 1]} : vector<2x128xf32> to vector<2x32xf32>
    %cst_23 = arith.constant 5.000000e-01 : f32
    %49 = vector.broadcast %cst_23 : f32 to vector<2x32xf32>
    %50 = arith.mulf %49, %48 : vector<2x32xf32>
    %cst_24 = arith.constant 5.000000e-01 : f32
    %51 = vector.broadcast %cst_24 : f32 to vector<2x32xf32>
    %52 = arith.addf %50, %51 : vector<2x32xf32>
    %53 = arith.mulf %46, %30 : vector<2x32xf32>
    %54 = arith.mulf %41, %47 : vector<2x32xf32>
    %55 = arith.addf %53, %54 : vector<2x32xf32>
    %56 = math.tanh %55 : vector<2x32xf32>
    %57 = arith.mulf %52, %56 : vector<2x32xf32>
    %58 = vector.extract_strided_slice %13 {offsets = [2, 0], sizes = [2, 128], strides = [1, 1]} : vector<16x128xf32> to vector<2x128xf32>
    %cst_25 = arith.constant dense<0.000000e+00> : vector<2x128xf32>
    %59 = tpu.matmul %57, %18, %cst_25 {dimension_numbers = #tpu.dot_dimension_numbers<[1], [0], [0], [1], [0, 0, 1, 1], [], []>} : vector<2x32xf32>, vector<32x128xf32>, vector<2x128xf32> -> vector<2x128xf32>
    %60 = arith.addf %58, %59 : vector<2x128xf32>
    %61 = vector.broadcast %28 : vector<1x128xf32> to vector<2x128xf32>
    %62 = arith.mulf %60, %61 : vector<2x128xf32>
    %63 = math.tanh %62 : vector<2x128xf32>
    %64 = vector.extract_strided_slice %63 {offsets = [0, 0], sizes = [2, 32], strides = [1, 1]} : vector<2x128xf32> to vector<2x32xf32>
    %cst_26 = arith.constant 5.000000e-01 : f32
    %65 = vector.broadcast %cst_26 : f32 to vector<2x32xf32>
    %66 = arith.mulf %65, %64 : vector<2x32xf32>
    %cst_27 = arith.constant 5.000000e-01 : f32
    %67 = vector.broadcast %cst_27 : f32 to vector<2x32xf32>
    %68 = arith.addf %66, %67 : vector<2x32xf32>
    %69 = vector.extract_strided_slice %63 {offsets = [0, 32], sizes = [2, 32], strides = [1, 1]} : vector<2x128xf32> to vector<2x32xf32>
    %cst_28 = arith.constant 5.000000e-01 : f32
    %70 = vector.broadcast %cst_28 : f32 to vector<2x32xf32>
    %71 = arith.mulf %70, %69 : vector<2x32xf32>
    %cst_29 = arith.constant 5.000000e-01 : f32
    %72 = vector.broadcast %cst_29 : f32 to vector<2x32xf32>
    %73 = arith.addf %71, %72 : vector<2x32xf32>
    %74 = vector.extract_strided_slice %63 {offsets = [0, 64], sizes = [2, 32], strides = [1, 1]} : vector<2x128xf32> to vector<2x32xf32>
    %75 = vector.extract_strided_slice %63 {offsets = [0, 96], sizes = [2, 32], strides = [1, 1]} : vector<2x128xf32> to vector<2x32xf32>
    %cst_30 = arith.constant 5.000000e-01 : f32
    %76 = vector.broadcast %cst_30 : f32 to vector<2x32xf32>
    %77 = arith.mulf %76, %75 : vector<2x32xf32>
    %cst_31 = arith.constant 5.000000e-01 : f32
    %78 = vector.broadcast %cst_31 : f32 to vector<2x32xf32>
    %79 = arith.addf %77, %78 : vector<2x32xf32>
    %80 = arith.mulf %73, %55 : vector<2x32xf32>
    %81 = arith.mulf %68, %74 : vector<2x32xf32>
    %82 = arith.addf %80, %81 : vector<2x32xf32>
    %83 = math.tanh %82 : vector<2x32xf32>
    %84 = arith.mulf %79, %83 : vector<2x32xf32>
    %85 = vector.extract_strided_slice %13 {offsets = [4, 0], sizes = [2, 128], strides = [1, 1]} : vector<16x128xf32> to vector<2x128xf32>
    %cst_32 = arith.constant dense<0.000000e+00> : vector<2x128xf32>
    %86 = tpu.matmul %84, %18, %cst_32 {dimension_numbers = #tpu.dot_dimension_numbers<[1], [0], [0], [1], [0, 0, 1, 1], [], []>} : vector<2x32xf32>, vector<32x128xf32>, vector<2x128xf32> -> vector<2x128xf32>
    %87 = arith.addf %85, %86 : vector<2x128xf32>
    %88 = vector.broadcast %28 : vector<1x128xf32> to vector<2x128xf32>
    %89 = arith.mulf %87, %88 : vector<2x128xf32>
    %90 = math.tanh %89 : vector<2x128xf32>
    %91 = vector.extract_strided_slice %90 {offsets = [0, 0], sizes = [2, 32], strides = [1, 1]} : vector<2x128xf32> to vector<2x32xf32>
    %cst_33 = arith.constant 5.000000e-01 : f32
    %92 = vector.broadcast %cst_33 : f32 to vector<2x32xf32>
    %93 = arith.mulf %92, %91 : vector<2x32xf32>
    %cst_34 = arith.constant 5.000000e-01 : f32
    %94 = vector.broadcast %cst_34 : f32 to vector<2x32xf32>
    %95 = arith.addf %93, %94 : vector<2x32xf32>
    %96 = vector.extract_strided_slice %90 {offsets = [0, 32], sizes = [2, 32], strides = [1, 1]} : vector<2x128xf32> to vector<2x32xf32>
    %cst_35 = arith.constant 5.000000e-01 : f32
    %97 = vector.broadcast %cst_35 : f32 to vector<2x32xf32>
    %98 = arith.mulf %97, %96 : vector<2x32xf32>
    %cst_36 = arith.constant 5.000000e-01 : f32
    %99 = vector.broadcast %cst_36 : f32 to vector<2x32xf32>
    %100 = arith.addf %98, %99 : vector<2x32xf32>
    %101 = vector.extract_strided_slice %90 {offsets = [0, 64], sizes = [2, 32], strides = [1, 1]} : vector<2x128xf32> to vector<2x32xf32>
    %102 = vector.extract_strided_slice %90 {offsets = [0, 96], sizes = [2, 32], strides = [1, 1]} : vector<2x128xf32> to vector<2x32xf32>
    %cst_37 = arith.constant 5.000000e-01 : f32
    %103 = vector.broadcast %cst_37 : f32 to vector<2x32xf32>
    %104 = arith.mulf %103, %102 : vector<2x32xf32>
    %cst_38 = arith.constant 5.000000e-01 : f32
    %105 = vector.broadcast %cst_38 : f32 to vector<2x32xf32>
    %106 = arith.addf %104, %105 : vector<2x32xf32>
    %107 = arith.mulf %100, %82 : vector<2x32xf32>
    %108 = arith.mulf %95, %101 : vector<2x32xf32>
    %109 = arith.addf %107, %108 : vector<2x32xf32>
    %110 = math.tanh %109 : vector<2x32xf32>
    %111 = arith.mulf %106, %110 : vector<2x32xf32>
    %112 = vector.extract_strided_slice %13 {offsets = [6, 0], sizes = [2, 128], strides = [1, 1]} : vector<16x128xf32> to vector<2x128xf32>
    %cst_39 = arith.constant dense<0.000000e+00> : vector<2x128xf32>
    %113 = tpu.matmul %111, %18, %cst_39 {dimension_numbers = #tpu.dot_dimension_numbers<[1], [0], [0], [1], [0, 0, 1, 1], [], []>} : vector<2x32xf32>, vector<32x128xf32>, vector<2x128xf32> -> vector<2x128xf32>
    %114 = arith.addf %112, %113 : vector<2x128xf32>
    %115 = vector.broadcast %28 : vector<1x128xf32> to vector<2x128xf32>
    %116 = arith.mulf %114, %115 : vector<2x128xf32>
    %117 = math.tanh %116 : vector<2x128xf32>
    %118 = vector.extract_strided_slice %117 {offsets = [0, 0], sizes = [2, 32], strides = [1, 1]} : vector<2x128xf32> to vector<2x32xf32>
    %cst_40 = arith.constant 5.000000e-01 : f32
    %119 = vector.broadcast %cst_40 : f32 to vector<2x32xf32>
    %120 = arith.mulf %119, %118 : vector<2x32xf32>
    %cst_41 = arith.constant 5.000000e-01 : f32
    %121 = vector.broadcast %cst_41 : f32 to vector<2x32xf32>
    %122 = arith.addf %120, %121 : vector<2x32xf32>
    %123 = vector.extract_strided_slice %117 {offsets = [0, 32], sizes = [2, 32], strides = [1, 1]} : vector<2x128xf32> to vector<2x32xf32>
    %cst_42 = arith.constant 5.000000e-01 : f32
    %124 = vector.broadcast %cst_42 : f32 to vector<2x32xf32>
    %125 = arith.mulf %124, %123 : vector<2x32xf32>
    %cst_43 = arith.constant 5.000000e-01 : f32
    %126 = vector.broadcast %cst_43 : f32 to vector<2x32xf32>
    %127 = arith.addf %125, %126 : vector<2x32xf32>
    %128 = vector.extract_strided_slice %117 {offsets = [0, 64], sizes = [2, 32], strides = [1, 1]} : vector<2x128xf32> to vector<2x32xf32>
    %129 = vector.extract_strided_slice %117 {offsets = [0, 96], sizes = [2, 32], strides = [1, 1]} : vector<2x128xf32> to vector<2x32xf32>
    %cst_44 = arith.constant 5.000000e-01 : f32
    %130 = vector.broadcast %cst_44 : f32 to vector<2x32xf32>
    %131 = arith.mulf %130, %129 : vector<2x32xf32>
    %cst_45 = arith.constant 5.000000e-01 : f32
    %132 = vector.broadcast %cst_45 : f32 to vector<2x32xf32>
    %133 = arith.addf %131, %132 : vector<2x32xf32>
    %134 = arith.mulf %127, %109 : vector<2x32xf32>
    %135 = arith.mulf %122, %128 : vector<2x32xf32>
    %136 = arith.addf %134, %135 : vector<2x32xf32>
    %137 = math.tanh %136 : vector<2x32xf32>
    %138 = arith.mulf %133, %137 : vector<2x32xf32>
    %139 = vector.extract_strided_slice %13 {offsets = [8, 0], sizes = [2, 128], strides = [1, 1]} : vector<16x128xf32> to vector<2x128xf32>
    %cst_46 = arith.constant dense<0.000000e+00> : vector<2x128xf32>
    %140 = tpu.matmul %138, %18, %cst_46 {dimension_numbers = #tpu.dot_dimension_numbers<[1], [0], [0], [1], [0, 0, 1, 1], [], []>} : vector<2x32xf32>, vector<32x128xf32>, vector<2x128xf32> -> vector<2x128xf32>
    %141 = arith.addf %139, %140 : vector<2x128xf32>
    %142 = vector.broadcast %28 : vector<1x128xf32> to vector<2x128xf32>
    %143 = arith.mulf %141, %142 : vector<2x128xf32>
    %144 = math.tanh %143 : vector<2x128xf32>
    %145 = vector.extract_strided_slice %144 {offsets = [0, 0], sizes = [2, 32], strides = [1, 1]} : vector<2x128xf32> to vector<2x32xf32>
    %cst_47 = arith.constant 5.000000e-01 : f32
    %146 = vector.broadcast %cst_47 : f32 to vector<2x32xf32>
    %147 = arith.mulf %146, %145 : vector<2x32xf32>
    %cst_48 = arith.constant 5.000000e-01 : f32
    %148 = vector.broadcast %cst_48 : f32 to vector<2x32xf32>
    %149 = arith.addf %147, %148 : vector<2x32xf32>
    %150 = vector.extract_strided_slice %144 {offsets = [0, 32], sizes = [2, 32], strides = [1, 1]} : vector<2x128xf32> to vector<2x32xf32>
    %cst_49 = arith.constant 5.000000e-01 : f32
    %151 = vector.broadcast %cst_49 : f32 to vector<2x32xf32>
    %152 = arith.mulf %151, %150 : vector<2x32xf32>
    %cst_50 = arith.constant 5.000000e-01 : f32
    %153 = vector.broadcast %cst_50 : f32 to vector<2x32xf32>
    %154 = arith.addf %152, %153 : vector<2x32xf32>
    %155 = vector.extract_strided_slice %144 {offsets = [0, 64], sizes = [2, 32], strides = [1, 1]} : vector<2x128xf32> to vector<2x32xf32>
    %156 = vector.extract_strided_slice %144 {offsets = [0, 96], sizes = [2, 32], strides = [1, 1]} : vector<2x128xf32> to vector<2x32xf32>
    %cst_51 = arith.constant 5.000000e-01 : f32
    %157 = vector.broadcast %cst_51 : f32 to vector<2x32xf32>
    %158 = arith.mulf %157, %156 : vector<2x32xf32>
    %cst_52 = arith.constant 5.000000e-01 : f32
    %159 = vector.broadcast %cst_52 : f32 to vector<2x32xf32>
    %160 = arith.addf %158, %159 : vector<2x32xf32>
    %161 = arith.mulf %154, %136 : vector<2x32xf32>
    %162 = arith.mulf %149, %155 : vector<2x32xf32>
    %163 = arith.addf %161, %162 : vector<2x32xf32>
    %164 = math.tanh %163 : vector<2x32xf32>
    %165 = arith.mulf %160, %164 : vector<2x32xf32>
    %166 = vector.extract_strided_slice %13 {offsets = [10, 0], sizes = [2, 128], strides = [1, 1]} : vector<16x128xf32> to vector<2x128xf32>
    %cst_53 = arith.constant dense<0.000000e+00> : vector<2x128xf32>
    %167 = tpu.matmul %165, %18, %cst_53 {dimension_numbers = #tpu.dot_dimension_numbers<[1], [0], [0], [1], [0, 0, 1, 1], [], []>} : vector<2x32xf32>, vector<32x128xf32>, vector<2x128xf32> -> vector<2x128xf32>
    %168 = arith.addf %166, %167 : vector<2x128xf32>
    %169 = vector.broadcast %28 : vector<1x128xf32> to vector<2x128xf32>
    %170 = arith.mulf %168, %169 : vector<2x128xf32>
    %171 = math.tanh %170 : vector<2x128xf32>
    %172 = vector.extract_strided_slice %171 {offsets = [0, 0], sizes = [2, 32], strides = [1, 1]} : vector<2x128xf32> to vector<2x32xf32>
    %cst_54 = arith.constant 5.000000e-01 : f32
    %173 = vector.broadcast %cst_54 : f32 to vector<2x32xf32>
    %174 = arith.mulf %173, %172 : vector<2x32xf32>
    %cst_55 = arith.constant 5.000000e-01 : f32
    %175 = vector.broadcast %cst_55 : f32 to vector<2x32xf32>
    %176 = arith.addf %174, %175 : vector<2x32xf32>
    %177 = vector.extract_strided_slice %171 {offsets = [0, 32], sizes = [2, 32], strides = [1, 1]} : vector<2x128xf32> to vector<2x32xf32>
    %cst_56 = arith.constant 5.000000e-01 : f32
    %178 = vector.broadcast %cst_56 : f32 to vector<2x32xf32>
    %179 = arith.mulf %178, %177 : vector<2x32xf32>
    %cst_57 = arith.constant 5.000000e-01 : f32
    %180 = vector.broadcast %cst_57 : f32 to vector<2x32xf32>
    %181 = arith.addf %179, %180 : vector<2x32xf32>
    %182 = vector.extract_strided_slice %171 {offsets = [0, 64], sizes = [2, 32], strides = [1, 1]} : vector<2x128xf32> to vector<2x32xf32>
    %183 = vector.extract_strided_slice %171 {offsets = [0, 96], sizes = [2, 32], strides = [1, 1]} : vector<2x128xf32> to vector<2x32xf32>
    %cst_58 = arith.constant 5.000000e-01 : f32
    %184 = vector.broadcast %cst_58 : f32 to vector<2x32xf32>
    %185 = arith.mulf %184, %183 : vector<2x32xf32>
    %cst_59 = arith.constant 5.000000e-01 : f32
    %186 = vector.broadcast %cst_59 : f32 to vector<2x32xf32>
    %187 = arith.addf %185, %186 : vector<2x32xf32>
    %188 = arith.mulf %181, %163 : vector<2x32xf32>
    %189 = arith.mulf %176, %182 : vector<2x32xf32>
    %190 = arith.addf %188, %189 : vector<2x32xf32>
    %191 = math.tanh %190 : vector<2x32xf32>
    %192 = arith.mulf %187, %191 : vector<2x32xf32>
    %193 = vector.extract_strided_slice %13 {offsets = [12, 0], sizes = [2, 128], strides = [1, 1]} : vector<16x128xf32> to vector<2x128xf32>
    %cst_60 = arith.constant dense<0.000000e+00> : vector<2x128xf32>
    %194 = tpu.matmul %192, %18, %cst_60 {dimension_numbers = #tpu.dot_dimension_numbers<[1], [0], [0], [1], [0, 0, 1, 1], [], []>} : vector<2x32xf32>, vector<32x128xf32>, vector<2x128xf32> -> vector<2x128xf32>
    %195 = arith.addf %193, %194 : vector<2x128xf32>
    %196 = vector.broadcast %28 : vector<1x128xf32> to vector<2x128xf32>
    %197 = arith.mulf %195, %196 : vector<2x128xf32>
    %198 = math.tanh %197 : vector<2x128xf32>
    %199 = vector.extract_strided_slice %198 {offsets = [0, 0], sizes = [2, 32], strides = [1, 1]} : vector<2x128xf32> to vector<2x32xf32>
    %cst_61 = arith.constant 5.000000e-01 : f32
    %200 = vector.broadcast %cst_61 : f32 to vector<2x32xf32>
    %201 = arith.mulf %200, %199 : vector<2x32xf32>
    %cst_62 = arith.constant 5.000000e-01 : f32
    %202 = vector.broadcast %cst_62 : f32 to vector<2x32xf32>
    %203 = arith.addf %201, %202 : vector<2x32xf32>
    %204 = vector.extract_strided_slice %198 {offsets = [0, 32], sizes = [2, 32], strides = [1, 1]} : vector<2x128xf32> to vector<2x32xf32>
    %cst_63 = arith.constant 5.000000e-01 : f32
    %205 = vector.broadcast %cst_63 : f32 to vector<2x32xf32>
    %206 = arith.mulf %205, %204 : vector<2x32xf32>
    %cst_64 = arith.constant 5.000000e-01 : f32
    %207 = vector.broadcast %cst_64 : f32 to vector<2x32xf32>
    %208 = arith.addf %206, %207 : vector<2x32xf32>
    %209 = vector.extract_strided_slice %198 {offsets = [0, 64], sizes = [2, 32], strides = [1, 1]} : vector<2x128xf32> to vector<2x32xf32>
    %210 = vector.extract_strided_slice %198 {offsets = [0, 96], sizes = [2, 32], strides = [1, 1]} : vector<2x128xf32> to vector<2x32xf32>
    %cst_65 = arith.constant 5.000000e-01 : f32
    %211 = vector.broadcast %cst_65 : f32 to vector<2x32xf32>
    %212 = arith.mulf %211, %210 : vector<2x32xf32>
    %cst_66 = arith.constant 5.000000e-01 : f32
    %213 = vector.broadcast %cst_66 : f32 to vector<2x32xf32>
    %214 = arith.addf %212, %213 : vector<2x32xf32>
    %215 = arith.mulf %208, %190 : vector<2x32xf32>
    %216 = arith.mulf %203, %209 : vector<2x32xf32>
    %217 = arith.addf %215, %216 : vector<2x32xf32>
    %218 = math.tanh %217 : vector<2x32xf32>
    %219 = arith.mulf %214, %218 : vector<2x32xf32>
    %220 = vector.extract_strided_slice %13 {offsets = [14, 0], sizes = [2, 128], strides = [1, 1]} : vector<16x128xf32> to vector<2x128xf32>
    %cst_67 = arith.constant dense<0.000000e+00> : vector<2x128xf32>
    %221 = tpu.matmul %219, %18, %cst_67 {dimension_numbers = #tpu.dot_dimension_numbers<[1], [0], [0], [1], [0, 0, 1, 1], [], []>} : vector<2x32xf32>, vector<32x128xf32>, vector<2x128xf32> -> vector<2x128xf32>
    %222 = arith.addf %220, %221 : vector<2x128xf32>
    %223 = vector.broadcast %28 : vector<1x128xf32> to vector<2x128xf32>
    %224 = arith.mulf %222, %223 : vector<2x128xf32>
    %225 = math.tanh %224 : vector<2x128xf32>
    %226 = vector.extract_strided_slice %225 {offsets = [0, 0], sizes = [2, 32], strides = [1, 1]} : vector<2x128xf32> to vector<2x32xf32>
    %cst_68 = arith.constant 5.000000e-01 : f32
    %227 = vector.broadcast %cst_68 : f32 to vector<2x32xf32>
    %228 = arith.mulf %227, %226 : vector<2x32xf32>
    %cst_69 = arith.constant 5.000000e-01 : f32
    %229 = vector.broadcast %cst_69 : f32 to vector<2x32xf32>
    %230 = arith.addf %228, %229 : vector<2x32xf32>
    %231 = vector.extract_strided_slice %225 {offsets = [0, 32], sizes = [2, 32], strides = [1, 1]} : vector<2x128xf32> to vector<2x32xf32>
    %cst_70 = arith.constant 5.000000e-01 : f32
    %232 = vector.broadcast %cst_70 : f32 to vector<2x32xf32>
    %233 = arith.mulf %232, %231 : vector<2x32xf32>
    %cst_71 = arith.constant 5.000000e-01 : f32
    %234 = vector.broadcast %cst_71 : f32 to vector<2x32xf32>
    %235 = arith.addf %233, %234 : vector<2x32xf32>
    %236 = vector.extract_strided_slice %225 {offsets = [0, 64], sizes = [2, 32], strides = [1, 1]} : vector<2x128xf32> to vector<2x32xf32>
    %237 = vector.extract_strided_slice %225 {offsets = [0, 96], sizes = [2, 32], strides = [1, 1]} : vector<2x128xf32> to vector<2x32xf32>
    %cst_72 = arith.constant 5.000000e-01 : f32
    %238 = vector.broadcast %cst_72 : f32 to vector<2x32xf32>
    %239 = arith.mulf %238, %237 : vector<2x32xf32>
    %cst_73 = arith.constant 5.000000e-01 : f32
    %240 = vector.broadcast %cst_73 : f32 to vector<2x32xf32>
    %241 = arith.addf %239, %240 : vector<2x32xf32>
    %242 = arith.mulf %235, %217 : vector<2x32xf32>
    %243 = arith.mulf %230, %236 : vector<2x32xf32>
    %244 = arith.addf %242, %243 : vector<2x32xf32>
    %245 = math.tanh %244 : vector<2x32xf32>
    %246 = arith.mulf %241, %245 : vector<2x32xf32>
    %247 = vector.extract_strided_slice %17 {offsets = [0, 0], sizes = [2, 128], strides = [1, 1]} : vector<16x128xf32> to vector<2x128xf32>
    %cst_74 = arith.constant dense<0.000000e+00> : vector<2x128xf32>
    %248 = tpu.matmul %246, %19, %cst_74 {dimension_numbers = #tpu.dot_dimension_numbers<[1], [0], [0], [1], [0, 0, 1, 1], [], []>} : vector<2x32xf32>, vector<32x128xf32>, vector<2x128xf32> -> vector<2x128xf32>
    %249 = arith.addf %247, %248 : vector<2x128xf32>
    %250 = vector.broadcast %28 : vector<1x128xf32> to vector<2x128xf32>
    %251 = arith.mulf %249, %250 : vector<2x128xf32>
    %252 = math.tanh %251 : vector<2x128xf32>
    %253 = vector.extract_strided_slice %252 {offsets = [0, 0], sizes = [2, 32], strides = [1, 1]} : vector<2x128xf32> to vector<2x32xf32>
    %cst_75 = arith.constant 5.000000e-01 : f32
    %254 = vector.broadcast %cst_75 : f32 to vector<2x32xf32>
    %255 = arith.mulf %254, %253 : vector<2x32xf32>
    %cst_76 = arith.constant 5.000000e-01 : f32
    %256 = vector.broadcast %cst_76 : f32 to vector<2x32xf32>
    %257 = arith.addf %255, %256 : vector<2x32xf32>
    %258 = vector.extract_strided_slice %252 {offsets = [0, 32], sizes = [2, 32], strides = [1, 1]} : vector<2x128xf32> to vector<2x32xf32>
    %cst_77 = arith.constant 5.000000e-01 : f32
    %259 = vector.broadcast %cst_77 : f32 to vector<2x32xf32>
    %260 = arith.mulf %259, %258 : vector<2x32xf32>
    %cst_78 = arith.constant 5.000000e-01 : f32
    %261 = vector.broadcast %cst_78 : f32 to vector<2x32xf32>
    %262 = arith.addf %260, %261 : vector<2x32xf32>
    %263 = vector.extract_strided_slice %252 {offsets = [0, 64], sizes = [2, 32], strides = [1, 1]} : vector<2x128xf32> to vector<2x32xf32>
    %264 = vector.extract_strided_slice %252 {offsets = [0, 96], sizes = [2, 32], strides = [1, 1]} : vector<2x128xf32> to vector<2x32xf32>
    %cst_79 = arith.constant 5.000000e-01 : f32
    %265 = vector.broadcast %cst_79 : f32 to vector<2x32xf32>
    %266 = arith.mulf %265, %264 : vector<2x32xf32>
    %cst_80 = arith.constant 5.000000e-01 : f32
    %267 = vector.broadcast %cst_80 : f32 to vector<2x32xf32>
    %268 = arith.addf %266, %267 : vector<2x32xf32>
    %269 = arith.mulf %262, %244 : vector<2x32xf32>
    %270 = arith.mulf %257, %263 : vector<2x32xf32>
    %271 = arith.addf %269, %270 : vector<2x32xf32>
    %272 = math.tanh %271 : vector<2x32xf32>
    %273 = arith.mulf %268, %272 : vector<2x32xf32>
    %274 = vector.extract_strided_slice %17 {offsets = [2, 0], sizes = [2, 128], strides = [1, 1]} : vector<16x128xf32> to vector<2x128xf32>
    %cst_81 = arith.constant dense<0.000000e+00> : vector<2x128xf32>
    %275 = tpu.matmul %273, %19, %cst_81 {dimension_numbers = #tpu.dot_dimension_numbers<[1], [0], [0], [1], [0, 0, 1, 1], [], []>} : vector<2x32xf32>, vector<32x128xf32>, vector<2x128xf32> -> vector<2x128xf32>
    %276 = arith.addf %274, %275 : vector<2x128xf32>
    %277 = vector.broadcast %28 : vector<1x128xf32> to vector<2x128xf32>
    %278 = arith.mulf %276, %277 : vector<2x128xf32>
    %279 = math.tanh %278 : vector<2x128xf32>
    %280 = vector.extract_strided_slice %279 {offsets = [0, 0], sizes = [2, 32], strides = [1, 1]} : vector<2x128xf32> to vector<2x32xf32>
    %cst_82 = arith.constant 5.000000e-01 : f32
    %281 = vector.broadcast %cst_82 : f32 to vector<2x32xf32>
    %282 = arith.mulf %281, %280 : vector<2x32xf32>
    %cst_83 = arith.constant 5.000000e-01 : f32
    %283 = vector.broadcast %cst_83 : f32 to vector<2x32xf32>
    %284 = arith.addf %282, %283 : vector<2x32xf32>
    %285 = vector.extract_strided_slice %279 {offsets = [0, 32], sizes = [2, 32], strides = [1, 1]} : vector<2x128xf32> to vector<2x32xf32>
    %cst_84 = arith.constant 5.000000e-01 : f32
    %286 = vector.broadcast %cst_84 : f32 to vector<2x32xf32>
    %287 = arith.mulf %286, %285 : vector<2x32xf32>
    %cst_85 = arith.constant 5.000000e-01 : f32
    %288 = vector.broadcast %cst_85 : f32 to vector<2x32xf32>
    %289 = arith.addf %287, %288 : vector<2x32xf32>
    %290 = vector.extract_strided_slice %279 {offsets = [0, 64], sizes = [2, 32], strides = [1, 1]} : vector<2x128xf32> to vector<2x32xf32>
    %291 = vector.extract_strided_slice %279 {offsets = [0, 96], sizes = [2, 32], strides = [1, 1]} : vector<2x128xf32> to vector<2x32xf32>
    %cst_86 = arith.constant 5.000000e-01 : f32
    %292 = vector.broadcast %cst_86 : f32 to vector<2x32xf32>
    %293 = arith.mulf %292, %291 : vector<2x32xf32>
    %cst_87 = arith.constant 5.000000e-01 : f32
    %294 = vector.broadcast %cst_87 : f32 to vector<2x32xf32>
    %295 = arith.addf %293, %294 : vector<2x32xf32>
    %296 = arith.mulf %289, %271 : vector<2x32xf32>
    %297 = arith.mulf %284, %290 : vector<2x32xf32>
    %298 = arith.addf %296, %297 : vector<2x32xf32>
    %299 = math.tanh %298 : vector<2x32xf32>
    %300 = arith.mulf %295, %299 : vector<2x32xf32>
    %301 = vector.extract_strided_slice %17 {offsets = [4, 0], sizes = [2, 128], strides = [1, 1]} : vector<16x128xf32> to vector<2x128xf32>
    %cst_88 = arith.constant dense<0.000000e+00> : vector<2x128xf32>
    %302 = tpu.matmul %300, %19, %cst_88 {dimension_numbers = #tpu.dot_dimension_numbers<[1], [0], [0], [1], [0, 0, 1, 1], [], []>} : vector<2x32xf32>, vector<32x128xf32>, vector<2x128xf32> -> vector<2x128xf32>
    %303 = arith.addf %301, %302 : vector<2x128xf32>
    %304 = vector.broadcast %28 : vector<1x128xf32> to vector<2x128xf32>
    %305 = arith.mulf %303, %304 : vector<2x128xf32>
    %306 = math.tanh %305 : vector<2x128xf32>
    %307 = vector.extract_strided_slice %306 {offsets = [0, 0], sizes = [2, 32], strides = [1, 1]} : vector<2x128xf32> to vector<2x32xf32>
    %cst_89 = arith.constant 5.000000e-01 : f32
    %308 = vector.broadcast %cst_89 : f32 to vector<2x32xf32>
    %309 = arith.mulf %308, %307 : vector<2x32xf32>
    %cst_90 = arith.constant 5.000000e-01 : f32
    %310 = vector.broadcast %cst_90 : f32 to vector<2x32xf32>
    %311 = arith.addf %309, %310 : vector<2x32xf32>
    %312 = vector.extract_strided_slice %306 {offsets = [0, 32], sizes = [2, 32], strides = [1, 1]} : vector<2x128xf32> to vector<2x32xf32>
    %cst_91 = arith.constant 5.000000e-01 : f32
    %313 = vector.broadcast %cst_91 : f32 to vector<2x32xf32>
    %314 = arith.mulf %313, %312 : vector<2x32xf32>
    %cst_92 = arith.constant 5.000000e-01 : f32
    %315 = vector.broadcast %cst_92 : f32 to vector<2x32xf32>
    %316 = arith.addf %314, %315 : vector<2x32xf32>
    %317 = vector.extract_strided_slice %306 {offsets = [0, 64], sizes = [2, 32], strides = [1, 1]} : vector<2x128xf32> to vector<2x32xf32>
    %318 = vector.extract_strided_slice %306 {offsets = [0, 96], sizes = [2, 32], strides = [1, 1]} : vector<2x128xf32> to vector<2x32xf32>
    %cst_93 = arith.constant 5.000000e-01 : f32
    %319 = vector.broadcast %cst_93 : f32 to vector<2x32xf32>
    %320 = arith.mulf %319, %318 : vector<2x32xf32>
    %cst_94 = arith.constant 5.000000e-01 : f32
    %321 = vector.broadcast %cst_94 : f32 to vector<2x32xf32>
    %322 = arith.addf %320, %321 : vector<2x32xf32>
    %323 = arith.mulf %316, %298 : vector<2x32xf32>
    %324 = arith.mulf %311, %317 : vector<2x32xf32>
    %325 = arith.addf %323, %324 : vector<2x32xf32>
    %326 = math.tanh %325 : vector<2x32xf32>
    %327 = arith.mulf %322, %326 : vector<2x32xf32>
    %328 = vector.extract_strided_slice %17 {offsets = [6, 0], sizes = [2, 128], strides = [1, 1]} : vector<16x128xf32> to vector<2x128xf32>
    %cst_95 = arith.constant dense<0.000000e+00> : vector<2x128xf32>
    %329 = tpu.matmul %327, %19, %cst_95 {dimension_numbers = #tpu.dot_dimension_numbers<[1], [0], [0], [1], [0, 0, 1, 1], [], []>} : vector<2x32xf32>, vector<32x128xf32>, vector<2x128xf32> -> vector<2x128xf32>
    %330 = arith.addf %328, %329 : vector<2x128xf32>
    %331 = vector.broadcast %28 : vector<1x128xf32> to vector<2x128xf32>
    %332 = arith.mulf %330, %331 : vector<2x128xf32>
    %333 = math.tanh %332 : vector<2x128xf32>
    %334 = vector.extract_strided_slice %333 {offsets = [0, 0], sizes = [2, 32], strides = [1, 1]} : vector<2x128xf32> to vector<2x32xf32>
    %cst_96 = arith.constant 5.000000e-01 : f32
    %335 = vector.broadcast %cst_96 : f32 to vector<2x32xf32>
    %336 = arith.mulf %335, %334 : vector<2x32xf32>
    %cst_97 = arith.constant 5.000000e-01 : f32
    %337 = vector.broadcast %cst_97 : f32 to vector<2x32xf32>
    %338 = arith.addf %336, %337 : vector<2x32xf32>
    %339 = vector.extract_strided_slice %333 {offsets = [0, 32], sizes = [2, 32], strides = [1, 1]} : vector<2x128xf32> to vector<2x32xf32>
    %cst_98 = arith.constant 5.000000e-01 : f32
    %340 = vector.broadcast %cst_98 : f32 to vector<2x32xf32>
    %341 = arith.mulf %340, %339 : vector<2x32xf32>
    %cst_99 = arith.constant 5.000000e-01 : f32
    %342 = vector.broadcast %cst_99 : f32 to vector<2x32xf32>
    %343 = arith.addf %341, %342 : vector<2x32xf32>
    %344 = vector.extract_strided_slice %333 {offsets = [0, 64], sizes = [2, 32], strides = [1, 1]} : vector<2x128xf32> to vector<2x32xf32>
    %345 = vector.extract_strided_slice %333 {offsets = [0, 96], sizes = [2, 32], strides = [1, 1]} : vector<2x128xf32> to vector<2x32xf32>
    %cst_100 = arith.constant 5.000000e-01 : f32
    %346 = vector.broadcast %cst_100 : f32 to vector<2x32xf32>
    %347 = arith.mulf %346, %345 : vector<2x32xf32>
    %cst_101 = arith.constant 5.000000e-01 : f32
    %348 = vector.broadcast %cst_101 : f32 to vector<2x32xf32>
    %349 = arith.addf %347, %348 : vector<2x32xf32>
    %350 = arith.mulf %343, %325 : vector<2x32xf32>
    %351 = arith.mulf %338, %344 : vector<2x32xf32>
    %352 = arith.addf %350, %351 : vector<2x32xf32>
    %353 = math.tanh %352 : vector<2x32xf32>
    %354 = arith.mulf %349, %353 : vector<2x32xf32>
    %355 = vector.extract_strided_slice %17 {offsets = [8, 0], sizes = [2, 128], strides = [1, 1]} : vector<16x128xf32> to vector<2x128xf32>
    %cst_102 = arith.constant dense<0.000000e+00> : vector<2x128xf32>
    %356 = tpu.matmul %354, %19, %cst_102 {dimension_numbers = #tpu.dot_dimension_numbers<[1], [0], [0], [1], [0, 0, 1, 1], [], []>} : vector<2x32xf32>, vector<32x128xf32>, vector<2x128xf32> -> vector<2x128xf32>
    %357 = arith.addf %355, %356 : vector<2x128xf32>
    %358 = vector.broadcast %28 : vector<1x128xf32> to vector<2x128xf32>
    %359 = arith.mulf %357, %358 : vector<2x128xf32>
    %360 = math.tanh %359 : vector<2x128xf32>
    %361 = vector.extract_strided_slice %360 {offsets = [0, 0], sizes = [2, 32], strides = [1, 1]} : vector<2x128xf32> to vector<2x32xf32>
    %cst_103 = arith.constant 5.000000e-01 : f32
    %362 = vector.broadcast %cst_103 : f32 to vector<2x32xf32>
    %363 = arith.mulf %362, %361 : vector<2x32xf32>
    %cst_104 = arith.constant 5.000000e-01 : f32
    %364 = vector.broadcast %cst_104 : f32 to vector<2x32xf32>
    %365 = arith.addf %363, %364 : vector<2x32xf32>
    %366 = vector.extract_strided_slice %360 {offsets = [0, 32], sizes = [2, 32], strides = [1, 1]} : vector<2x128xf32> to vector<2x32xf32>
    %cst_105 = arith.constant 5.000000e-01 : f32
    %367 = vector.broadcast %cst_105 : f32 to vector<2x32xf32>
    %368 = arith.mulf %367, %366 : vector<2x32xf32>
    %cst_106 = arith.constant 5.000000e-01 : f32
    %369 = vector.broadcast %cst_106 : f32 to vector<2x32xf32>
    %370 = arith.addf %368, %369 : vector<2x32xf32>
    %371 = vector.extract_strided_slice %360 {offsets = [0, 64], sizes = [2, 32], strides = [1, 1]} : vector<2x128xf32> to vector<2x32xf32>
    %372 = vector.extract_strided_slice %360 {offsets = [0, 96], sizes = [2, 32], strides = [1, 1]} : vector<2x128xf32> to vector<2x32xf32>
    %cst_107 = arith.constant 5.000000e-01 : f32
    %373 = vector.broadcast %cst_107 : f32 to vector<2x32xf32>
    %374 = arith.mulf %373, %372 : vector<2x32xf32>
    %cst_108 = arith.constant 5.000000e-01 : f32
    %375 = vector.broadcast %cst_108 : f32 to vector<2x32xf32>
    %376 = arith.addf %374, %375 : vector<2x32xf32>
    %377 = arith.mulf %370, %352 : vector<2x32xf32>
    %378 = arith.mulf %365, %371 : vector<2x32xf32>
    %379 = arith.addf %377, %378 : vector<2x32xf32>
    %380 = math.tanh %379 : vector<2x32xf32>
    %381 = arith.mulf %376, %380 : vector<2x32xf32>
    %382 = vector.extract_strided_slice %17 {offsets = [10, 0], sizes = [2, 128], strides = [1, 1]} : vector<16x128xf32> to vector<2x128xf32>
    %cst_109 = arith.constant dense<0.000000e+00> : vector<2x128xf32>
    %383 = tpu.matmul %381, %19, %cst_109 {dimension_numbers = #tpu.dot_dimension_numbers<[1], [0], [0], [1], [0, 0, 1, 1], [], []>} : vector<2x32xf32>, vector<32x128xf32>, vector<2x128xf32> -> vector<2x128xf32>
    %384 = arith.addf %382, %383 : vector<2x128xf32>
    %385 = vector.broadcast %28 : vector<1x128xf32> to vector<2x128xf32>
    %386 = arith.mulf %384, %385 : vector<2x128xf32>
    %387 = math.tanh %386 : vector<2x128xf32>
    %388 = vector.extract_strided_slice %387 {offsets = [0, 0], sizes = [2, 32], strides = [1, 1]} : vector<2x128xf32> to vector<2x32xf32>
    %cst_110 = arith.constant 5.000000e-01 : f32
    %389 = vector.broadcast %cst_110 : f32 to vector<2x32xf32>
    %390 = arith.mulf %389, %388 : vector<2x32xf32>
    %cst_111 = arith.constant 5.000000e-01 : f32
    %391 = vector.broadcast %cst_111 : f32 to vector<2x32xf32>
    %392 = arith.addf %390, %391 : vector<2x32xf32>
    %393 = vector.extract_strided_slice %387 {offsets = [0, 32], sizes = [2, 32], strides = [1, 1]} : vector<2x128xf32> to vector<2x32xf32>
    %cst_112 = arith.constant 5.000000e-01 : f32
    %394 = vector.broadcast %cst_112 : f32 to vector<2x32xf32>
    %395 = arith.mulf %394, %393 : vector<2x32xf32>
    %cst_113 = arith.constant 5.000000e-01 : f32
    %396 = vector.broadcast %cst_113 : f32 to vector<2x32xf32>
    %397 = arith.addf %395, %396 : vector<2x32xf32>
    %398 = vector.extract_strided_slice %387 {offsets = [0, 64], sizes = [2, 32], strides = [1, 1]} : vector<2x128xf32> to vector<2x32xf32>
    %399 = vector.extract_strided_slice %387 {offsets = [0, 96], sizes = [2, 32], strides = [1, 1]} : vector<2x128xf32> to vector<2x32xf32>
    %cst_114 = arith.constant 5.000000e-01 : f32
    %400 = vector.broadcast %cst_114 : f32 to vector<2x32xf32>
    %401 = arith.mulf %400, %399 : vector<2x32xf32>
    %cst_115 = arith.constant 5.000000e-01 : f32
    %402 = vector.broadcast %cst_115 : f32 to vector<2x32xf32>
    %403 = arith.addf %401, %402 : vector<2x32xf32>
    %404 = arith.mulf %397, %379 : vector<2x32xf32>
    %405 = arith.mulf %392, %398 : vector<2x32xf32>
    %406 = arith.addf %404, %405 : vector<2x32xf32>
    %407 = math.tanh %406 : vector<2x32xf32>
    %408 = arith.mulf %403, %407 : vector<2x32xf32>
    %409 = vector.extract_strided_slice %17 {offsets = [12, 0], sizes = [2, 128], strides = [1, 1]} : vector<16x128xf32> to vector<2x128xf32>
    %cst_116 = arith.constant dense<0.000000e+00> : vector<2x128xf32>
    %410 = tpu.matmul %408, %19, %cst_116 {dimension_numbers = #tpu.dot_dimension_numbers<[1], [0], [0], [1], [0, 0, 1, 1], [], []>} : vector<2x32xf32>, vector<32x128xf32>, vector<2x128xf32> -> vector<2x128xf32>
    %411 = arith.addf %409, %410 : vector<2x128xf32>
    %412 = vector.broadcast %28 : vector<1x128xf32> to vector<2x128xf32>
    %413 = arith.mulf %411, %412 : vector<2x128xf32>
    %414 = math.tanh %413 : vector<2x128xf32>
    %415 = vector.extract_strided_slice %414 {offsets = [0, 0], sizes = [2, 32], strides = [1, 1]} : vector<2x128xf32> to vector<2x32xf32>
    %cst_117 = arith.constant 5.000000e-01 : f32
    %416 = vector.broadcast %cst_117 : f32 to vector<2x32xf32>
    %417 = arith.mulf %416, %415 : vector<2x32xf32>
    %cst_118 = arith.constant 5.000000e-01 : f32
    %418 = vector.broadcast %cst_118 : f32 to vector<2x32xf32>
    %419 = arith.addf %417, %418 : vector<2x32xf32>
    %420 = vector.extract_strided_slice %414 {offsets = [0, 32], sizes = [2, 32], strides = [1, 1]} : vector<2x128xf32> to vector<2x32xf32>
    %cst_119 = arith.constant 5.000000e-01 : f32
    %421 = vector.broadcast %cst_119 : f32 to vector<2x32xf32>
    %422 = arith.mulf %421, %420 : vector<2x32xf32>
    %cst_120 = arith.constant 5.000000e-01 : f32
    %423 = vector.broadcast %cst_120 : f32 to vector<2x32xf32>
    %424 = arith.addf %422, %423 : vector<2x32xf32>
    %425 = vector.extract_strided_slice %414 {offsets = [0, 64], sizes = [2, 32], strides = [1, 1]} : vector<2x128xf32> to vector<2x32xf32>
    %426 = vector.extract_strided_slice %414 {offsets = [0, 96], sizes = [2, 32], strides = [1, 1]} : vector<2x128xf32> to vector<2x32xf32>
    %cst_121 = arith.constant 5.000000e-01 : f32
    %427 = vector.broadcast %cst_121 : f32 to vector<2x32xf32>
    %428 = arith.mulf %427, %426 : vector<2x32xf32>
    %cst_122 = arith.constant 5.000000e-01 : f32
    %429 = vector.broadcast %cst_122 : f32 to vector<2x32xf32>
    %430 = arith.addf %428, %429 : vector<2x32xf32>
    %431 = arith.mulf %424, %406 : vector<2x32xf32>
    %432 = arith.mulf %419, %425 : vector<2x32xf32>
    %433 = arith.addf %431, %432 : vector<2x32xf32>
    %434 = math.tanh %433 : vector<2x32xf32>
    %435 = arith.mulf %430, %434 : vector<2x32xf32>
    %436 = vector.extract_strided_slice %17 {offsets = [14, 0], sizes = [2, 128], strides = [1, 1]} : vector<16x128xf32> to vector<2x128xf32>
    %cst_123 = arith.constant dense<0.000000e+00> : vector<2x128xf32>
    %437 = tpu.matmul %435, %19, %cst_123 {dimension_numbers = #tpu.dot_dimension_numbers<[1], [0], [0], [1], [0, 0, 1, 1], [], []>} : vector<2x32xf32>, vector<32x128xf32>, vector<2x128xf32> -> vector<2x128xf32>
    %438 = arith.addf %436, %437 : vector<2x128xf32>
    %439 = vector.broadcast %28 : vector<1x128xf32> to vector<2x128xf32>
    %440 = arith.mulf %438, %439 : vector<2x128xf32>
    %441 = math.tanh %440 : vector<2x128xf32>
    %442 = vector.extract_strided_slice %441 {offsets = [0, 0], sizes = [2, 32], strides = [1, 1]} : vector<2x128xf32> to vector<2x32xf32>
    %cst_124 = arith.constant 5.000000e-01 : f32
    %443 = vector.broadcast %cst_124 : f32 to vector<2x32xf32>
    %444 = arith.mulf %443, %442 : vector<2x32xf32>
    %cst_125 = arith.constant 5.000000e-01 : f32
    %445 = vector.broadcast %cst_125 : f32 to vector<2x32xf32>
    %446 = arith.addf %444, %445 : vector<2x32xf32>
    %447 = vector.extract_strided_slice %441 {offsets = [0, 32], sizes = [2, 32], strides = [1, 1]} : vector<2x128xf32> to vector<2x32xf32>
    %cst_126 = arith.constant 5.000000e-01 : f32
    %448 = vector.broadcast %cst_126 : f32 to vector<2x32xf32>
    %449 = arith.mulf %448, %447 : vector<2x32xf32>
    %cst_127 = arith.constant 5.000000e-01 : f32
    %450 = vector.broadcast %cst_127 : f32 to vector<2x32xf32>
    %451 = arith.addf %449, %450 : vector<2x32xf32>
    %452 = vector.extract_strided_slice %441 {offsets = [0, 64], sizes = [2, 32], strides = [1, 1]} : vector<2x128xf32> to vector<2x32xf32>
    %453 = vector.extract_strided_slice %441 {offsets = [0, 96], sizes = [2, 32], strides = [1, 1]} : vector<2x128xf32> to vector<2x32xf32>
    %cst_128 = arith.constant 5.000000e-01 : f32
    %454 = vector.broadcast %cst_128 : f32 to vector<2x32xf32>
    %455 = arith.mulf %454, %453 : vector<2x32xf32>
    %cst_129 = arith.constant 5.000000e-01 : f32
    %456 = vector.broadcast %cst_129 : f32 to vector<2x32xf32>
    %457 = arith.addf %455, %456 : vector<2x32xf32>
    %458 = arith.mulf %451, %433 : vector<2x32xf32>
    %459 = arith.mulf %446, %452 : vector<2x32xf32>
    %460 = arith.addf %458, %459 : vector<2x32xf32>
    %461 = math.tanh %460 : vector<2x32xf32>
    %462 = arith.mulf %457, %461 : vector<2x32xf32>
    %463 = vector.extract_strided_slice %273 {offsets = [0, 0], sizes = [1, 32], strides = [1, 1]} : vector<2x32xf32> to vector<1x32xf32>
    %464 = vector.extract_strided_slice %300 {offsets = [0, 0], sizes = [1, 32], strides = [1, 1]} : vector<2x32xf32> to vector<1x32xf32>
    %465 = vector.extract_strided_slice %327 {offsets = [0, 0], sizes = [1, 32], strides = [1, 1]} : vector<2x32xf32> to vector<1x32xf32>
    %466 = vector.extract_strided_slice %354 {offsets = [0, 0], sizes = [1, 32], strides = [1, 1]} : vector<2x32xf32> to vector<1x32xf32>
    %467 = vector.extract_strided_slice %381 {offsets = [0, 0], sizes = [1, 32], strides = [1, 1]} : vector<2x32xf32> to vector<1x32xf32>
    %468 = vector.extract_strided_slice %408 {offsets = [0, 0], sizes = [1, 32], strides = [1, 1]} : vector<2x32xf32> to vector<1x32xf32>
    %469 = vector.extract_strided_slice %435 {offsets = [0, 0], sizes = [1, 32], strides = [1, 1]} : vector<2x32xf32> to vector<1x32xf32>
    %470 = vector.extract_strided_slice %462 {offsets = [0, 0], sizes = [1, 32], strides = [1, 1]} : vector<2x32xf32> to vector<1x32xf32>
    %471 = vector.extract_strided_slice %273 {offsets = [1, 0], sizes = [1, 32], strides = [1, 1]} : vector<2x32xf32> to vector<1x32xf32>
    %472 = vector.extract_strided_slice %300 {offsets = [1, 0], sizes = [1, 32], strides = [1, 1]} : vector<2x32xf32> to vector<1x32xf32>
    %473 = vector.extract_strided_slice %327 {offsets = [1, 0], sizes = [1, 32], strides = [1, 1]} : vector<2x32xf32> to vector<1x32xf32>
    %474 = vector.extract_strided_slice %354 {offsets = [1, 0], sizes = [1, 32], strides = [1, 1]} : vector<2x32xf32> to vector<1x32xf32>
    %475 = vector.extract_strided_slice %381 {offsets = [1, 0], sizes = [1, 32], strides = [1, 1]} : vector<2x32xf32> to vector<1x32xf32>
    %476 = vector.extract_strided_slice %408 {offsets = [1, 0], sizes = [1, 32], strides = [1, 1]} : vector<2x32xf32> to vector<1x32xf32>
    %477 = vector.extract_strided_slice %435 {offsets = [1, 0], sizes = [1, 32], strides = [1, 1]} : vector<2x32xf32> to vector<1x32xf32>
    %478 = vector.extract_strided_slice %462 {offsets = [1, 0], sizes = [1, 32], strides = [1, 1]} : vector<2x32xf32> to vector<1x32xf32>
    %479 = tpu.concatenate %463, %464, %465, %466, %467, %468, %469, %470, %471, %472, %473, %474, %475, %476, %477, %478 in 0 : vector<1x32xf32>, vector<1x32xf32>, vector<1x32xf32>, vector<1x32xf32>, vector<1x32xf32>, vector<1x32xf32>, vector<1x32xf32>, vector<1x32xf32>, vector<1x32xf32>, vector<1x32xf32>, vector<1x32xf32>, vector<1x32xf32>, vector<1x32xf32>, vector<1x32xf32>, vector<1x32xf32>, vector<1x32xf32> -> vector<16x32xf32>
    %c0_130 = arith.constant 0 : index
    %c0_131 = arith.constant 0 : index
    %480 = vector.load %arg7[%c0_130, %c0_131] : memref<32x32xf32, #tpu.memory_space<vmem>>, vector<32x32xf32>
    %cst_132 = arith.constant dense<0.000000e+00> : vector<16x32xf32>
    %481 = tpu.matmul %479, %480, %cst_132 {dimension_numbers = #tpu.dot_dimension_numbers<[1], [0], [0], [1], [0, 0, 1, 1], [], []>} : vector<16x32xf32>, vector<32x32xf32>, vector<16x32xf32> -> vector<16x32xf32>
    %c0_133 = arith.constant 0 : index
    %c0_134 = arith.constant 0 : index
    %482 = vector.load %arg8[%c0_133, %c0_134] : memref<1x32xf32, #tpu.memory_space<vmem>>, vector<1x32xf32>
    %483 = vector.broadcast %482 : vector<1x32xf32> to vector<16x32xf32>
    %484 = arith.addf %481, %483 : vector<16x32xf32>
    %485 = vector.shape_cast %484 : vector<16x32xf32> to vector<2x8x32xf32>
    %c0_135 = arith.constant 0 : index
    %c0_136 = arith.constant 0 : index
    %c0_137 = arith.constant 0 : index
    %486 = vector.load %arg9[%c0_135, %c0_136, %c0_137] : memref<2x8x32xf32, #tpu.memory_space<vmem>>, vector<2x8x32xf32>
    tpu.vector_store %arg9[%c0_135, %c0_136, %c0_137], %485 {strides = array<i32>} : memref<2x8x32xf32, #tpu.memory_space<vmem>>, vector<2x8x32xf32>,
    return
  }
}

</mosaic_0001>

<bundles_post_ra>
// kernel: totum_seq2seq.1
= control target key start
LH: loop header
LB: loop body
LE: loop exit
PB: predicated region body
PF: predicated region fallthrough
CT: control target
= control target key end

     0   :  { %v2652_v2 = vmov 0   ;;  %s3076_s0 = inlined_call_operand.vmem [shape: s32[32,1], index: 0, kind: input, shape index: {}]   ;;  %s3077_s1 = inlined_call_operand.vmem [shape: f32[32,32], index: 1, kind: input, shape index: {}]   ;;  %s3078_s2 = inlined_call_operand.vmem [shape: f32[32,256], index: 2, kind: input, shape index: {}]   ;;  %s3079_s3 = inlined_call_operand.vmem [shape: f32[32,128], index: 3, kind: input, shape index: {}]   ;;  %s3080_s4 = inlined_call_operand.vmem [shape: f32[1,128], index: 4, kind: input, shape index: {}]   ;;  %s3081_s5 = inlined_call_operand.vmem [shape: f32[32,128], index: 5, kind: input, shape index: {}]   ;;  %s3082_s6 = inlined_call_operand.vmem [shape: f32[1,128], index: 6, kind: input, shape index: {}]   ;;  %s3083_s7 = inlined_call_operand.vmem [shape: f32[32,32], index: 7, kind: input, shape index: {}]   ;;  %s3084_s8 = inlined_call_operand.vmem [shape: f32[1,32], index: 8, kind: input, shape index: {}]   ;;  %s3085_s9 = inlined_call_operand.hbm [shape: f32[2,8,32], index: 9, kind: output, shape index: {}]  }
   0x1   :  { %v33_v0 = vld [vmem:[%s3076_s0] sm:$0xff]  ;;  %2562 = vset.pattern.permute.xlu0 %v2652_v2  ;;  %v64_v3 = vld [vmem:[%s3077_s1 + $0x8] sm:$0xff]  ;;  %v65_v4 = vld [vmem:[%s3077_s1 + $0x10] sm:$0xff]  ;;  %2563 = vset.pattern.permute.xlu1 %v2652_v2 }
   0x2   :  { %v63_v1 = vld [vmem:[%s3077_s1] sm:$0xff]  ;;  %v66_v5 = vld [vmem:[%s3077_s1 + $0x18] sm:$0xff]  ;;  %40 = vperm.xlu0 %2562, %v33_v0  }
   0x3   :  { %v2432_v6 = vpack.c.bf16 %v64_v3, %v63_v1  ;;  %v2436_v7 = vpack.c.bf16 %v66_v5, %v65_v4 }
   0x4   :  { %14 = vsyncpa [#allocation3], 0  ;;  %v34_v8 = vld [vmem:[%s3076_s0 + $0x8] sm:$0xff]  ;;  %v2653_v9 = vmov 0.0   ;;  %v35_v10 = vld [vmem:[%s3076_s0 + $0x10] sm:$0xff]  ;;  %v2654_v17 = vmov 0.0|0.0   ;;  %v37_v25 = vlaneseq }
   0x5   :  { %249 = vmatprep.mubr.f32.mxu1 %v2653_v9  ;;  %2433 = vmatprep.subr.bf16.mxu0 %v2432_v6  ;;  %v36_v11 = vld [vmem:[%s3076_s0 + $0x18] sm:$0xff]  ;;  %v166_v12 = vld [vmem:[%s3078_s2 + $0x8] sm:$0xff]  ;;  %v165_v14 = vld [vmem:[%s3078_s2] sm:$0xff]  ;;  %vm67_vm0 = vcmask 261120   ;;  %vm2655_vm5 = vmmov 0   ;;  %v2656_v51 = vmov 0.5  }
   0x6   :  { %2435 = vmatpush3.bf16.msra.mxu0 %v2432_v6  ;;  %43 = vperm.xlu0 %2562, %v34_v8   ;;  %v168_v13 = vld [vmem:[%s3078_s2 + $0x18] sm:$0xff]  ;;  %v167_v16 = vld [vmem:[%s3078_s2 + $0x10] sm:$0xff]  ;;  %v170_v19 = vld [vmem:[%s3078_s2 + $0x28] sm:$0xff]  ;;  %v38_v26 = vand.u32 127, %v37_v25  ;;  %s2657_s26 = smov 64   ;;  %s2658_s27 = smov 32  }
   0x7   :  { %2437 = vmatprep.subr.bf16.mxu0 %v2436_v7  ;;  %46 = vperm.xlu1 %2563, %v35_v10   ;;  %v2440_v15 = vpack.c.bf16 %v168_v13, %v166_v12  ;;  %v2442_v18 = vpack.c.bf16 %v167_v16, %v165_v14  ;;  %v172_v20 = vld [vmem:[%s3078_s2 + $0x38] sm:$0xff]  ;;  %v169_v21 = vld [vmem:[%s3078_s2 + $0x20] sm:$0xff]  ;;  %v171_v23 = vld [vmem:[%s3078_s2 + $0x30] sm:$0xff]  ;;  %vm1970_vm9 = vcmask 1040384   ;;  %vm1972_vm10 = vcmask 1041408   ;;  %s2659_s21 = smov [#allocation2]  }
   0x8   :  { %v2444_v22 = vpack.c.bf16 %v172_v20, %v170_v19  ;;  %v2446_v24 = vpack.c.bf16 %v171_v23, %v169_v21  ;;  %v288_v28 = vld [vmem:[%s3079_s3] sm:$0xff]  ;;  %v289_v29 = vld [vmem:[%s3079_s3 + $0x8] sm:$0xff]  ;;  %v290_v38 = vld [vmem:[%s3079_s3 + $0x10] sm:$0xff]  ;;  %vm296_vm6 = vcmp.ge.s32.totalorder %v38_v26, 64  ;;  %vm297_vm7 = vcmp.lt.s32.totalorder %v38_v26, 96  ;;  %s2094_s2 = sshll.u32 %s2659_s21, 4  ;;  %s2095_s2 = int_to_ptr.vmem [resolvable:$true] %s2094_s2 }
   0x9   :  { %2441 = vmatprep.subr.bf16.mxu1 %v2440_v15  ;;  %v2771_v32 = vpack.c.bf16 %v289_v29, %v288_v28  ;;  %v291_v39 = vld [vmem:[%s3079_s3 + $0x18] sm:$0xff]  ;;  %v2117_v47 = vld [vmem:[%s3080_s4] ss:$0 sm:$0xff]  ;;  %vm298_vm8 = vmand %vm296_vm6, %vm297_vm7  ;;  %vm1974_vm11 = vcmask 1042432   ;;  %vm1976_vm12 = vcmask 1043456   ;;  %vm1978_vm13 = vcmask 1044480   ;;  %p2633_p1 = scmp.lt.s32.totalorder %s2095_s2, %s2095_s2 }
   0xa   :  { %2439 = vmatpush3.bf16.msra.mxu0 %v2436_v7  ;;  %2443 = vmatpush1.bf16.msra.mxu1 %v2442_v18  ;;  %v2787_v40 = vpack.c.bf16 %v291_v39, %v290_v38  ;;  %v2818_v52 = vsel %vm298_vm8, 1.0, %v2656_v51  ;;  %v2829_v60 = vld [vmem:[%s3082_s6] ss:$0 sm:$0xff]  ;;  %vm1980_vm14 = vcmask 1045504   ;;  %vm1982_vm15 = vcmask 1046528   ;;  %s2628_s22 = scalar_lea.vmem %s2095_s2, 256 }
   0xb   :  { %49 = vperm.xlu1 %2563, %v36_v11   ;;  %2448 = vmatprep.subr.bf16.mxu0 %v2654_v17  ;;  %p2629_p0 = scmp.ne.s32.totalorder %s2095_s2, %s2628_s22  ;;  %p2634_p2 = scmp.lt.s32.totalorder %s2628_s22, %s2628_s22 }
   0xc   :  { %2445 = vmatprep.subr.bf16.mxu1 %v2444_v22 }
   0xd   :  { %p2635_p3 = por %p2634_p2, %p2633_p1 }
   0xe   :  { %2447 = vmatpush1.bf16.msra.mxu1 %v2446_v24 }
   0xf   :  { %2460 = vmatprep.subr.bf16.mxu1 %v2654_v17  ;;  %p2636_p4 = pnand %p2635_p3, %p2629_p0 }
  0x81   :  { %v41_v27 = vpop.permute.xlu0 %40 }
  0x82   :  { %vm51_vm1 = vcmp.eq.s32.totalorder %v41_v27, %v38_v26 }
  0x83   :  { %v2105_v30 = vsel %vm51_vm1, 1.0, %v2653_v9 }
  0x84   :  { %2239 = vmatprep.mubr.msk.f32.mxu0 %vm67_vm0, %v2105_v30 }
  0x85   :  { %v44_v31 = vpop.permute.xlu0 %43 }
  0x86   :  { %vm52_vm2 = vcmp.eq.s32.totalorder %v44_v31, %v38_v26  ;;  %v47_v34 = vpop.permute.xlu1 %46 }
  0x87   :  { %v2106_v33 = vsel %vm52_vm2, 1.0, %v2653_v9  ;;  %vm53_vm3 = vcmp.eq.s32.totalorder %v47_v34, %v38_v26 }
  0x88   :  { %2240 = vmatmul.mubr.msk.f32.vlgmr.msra.gmra.mrb[0].mxu0 %vm67_vm0, %v2106_v33  ;;  %v2107_v35 = vsel %vm53_vm3, 1.0, %v2653_v9 }
  0x89   :  { %2450 = vmatpush3.bf16.msra.mxu0 %v2771_v32  ;;  %2242 = vmatprep.mubr.msk.f32.mxu0 %vm67_vm0, %v2107_v35 }
  0x8a   :  { %2451 = vmatprep.subr.bf16.mxu0 %v2654_v17  ;;  %v50_v36 = vpop.permute.xlu1 %49 }
  0x8b   :  { %vm54_vm4 = vcmp.eq.s32.totalorder %v50_v36, %v38_v26 }
  0x8c   :  { %v2108_v37 = vsel %vm54_vm4, 1.0, %v2653_v9 }
  0x8d   :  { %2243 = vmatmul.mubr.msk.f32.gmra.mrb[2].mxu0 %vm67_vm0, %v2108_v37 }
  0x8e   :  { %2453 = vmatpush3.bf16.msra.mxu0 %v2787_v40  ;;  %2253 = vmatprep.mubr.msk.f32.mxu0 %vm2655_vm5, %v2653_v9 }
  0x8f   :  { %2454 = vmatprep.subr.bf16.mxu0 %v2654_v17 }
  0x91   :  { %2254 = vmatmul.mubr.f32.vlgmr.msra.gmra.mrb[4].mxu0 %v2653_v9 }
  0x92   :  { %2456 = vmatpush3.bf16.msra.mxu0 %v2771_v32  ;;  %2264 = vmatprep.mubr.msk.f32.mxu0 %vm2655_vm5, %v2653_v9 }
  0x93   :  { %2457 = vmatprep.subr.bf16.mxu0 %v2654_v17 }
  0x96   :  { %2459 = vmatpush3.bf16.msra.mxu0 %v2787_v40 }
  0x97   :  { %2466 = vmatprep.subr.bf16.mxu0 %v2654_v17 }
 0x15b   :  { %v2241_v41 = vpop.f32.mrb[0].mxu0 }
 0x15c   :  { %v146_v42 = vpop.f32.mrb[1].mxu0 }
 0x15d   :  { %2113 = vmatmul.mubr.msk.f32.vlgmr.msra.gmra.mrb[0].mxu1 %vm67_vm0, %v146_v42 }
 0x15e   :  { %254 = vmatprep.mubr.f32.mxu1 %v2653_v9  ;;  %2462 = vmatpush3.bf16.msra.mxu1 %v2771_v32 }
 0x15f   :  { %2463 = vmatprep.subr.bf16.mxu1 %v2654_v17 }
 0x160   :  { %v2244_v43 = vpop.f32.mrb[2].mxu0 }
 0x161   :  { %2114 = vmatmul.mubr.msk.f32.gmra.mrb[2].mxu1 %vm67_vm0, %v2241_v41  ;;  %v156_v44 = vpop.f32.mrb[3].mxu0 }
 0x162   :  { %259 = vmatprep.mubr.f32.mxu1 %v2653_v9  ;;  %2465 = vmatpush3.bf16.msra.mxu1 %v2787_v40 }
 0x163   :  { %2472 = vmatprep.subr.bf16.mxu1 %v2654_v17 }
 0x164   :  { %v369_v45 = vpop.f32.mrb[4].mxu0 }
 0x165   :  { %2115 = vmatmul.mubr.msk.f32.gmra.mrb[4].mxu1 %vm67_vm0, %v156_v44  ;;  %v2255_v46 = vpop.f32.mrb[5].mxu0 }
 0x166   :  { %264 = vmatprep.mubr.f32.mxu1 %v2653_v9 }
 0x169   :  { %2116 = vmatmul.mubr.msk.f32.gmra.mrb[6].mxu1 %vm67_vm0, %v2244_v43 }
 0x16a   :  { %2275 = vmatprep.mubr.msk.f32.mxu1 %vm2655_vm5, %v2653_v9 }
 0x230   :  { %v251_v48 = vpop.f32.mrb[0].mxu1 }
 0x231   :  { %v2816_v49 = vadd.f32 %v2117_v47, %v251_v48  ;;  %v253_v50 = vpop.f32.mrb[1].mxu1 }
 0x233   :  { %v373_v53 = vadd.f32 %v369_v45, %v2816_v49 }
 0x234   :  { %v256_v54 = vpop.f32.mrb[2].mxu1 }
 0x235   :  { %v374_v55 = vmul.f32 %v373_v53, %v2818_v52  ;;  %v2822_v56 = vadd.f32 %v2117_v47, %v256_v54  ;;  %v258_v57 = vpop.f32.mrb[3].mxu1 }
 0x237   :  { %2564 = vtanh.f32 %v374_v55 }
 0x238   :  { %v261_v58 = vpop.f32.mrb[4].mxu1 }
 0x239   :  { %v2824_v59 = vpop.f32.mrb[5].mxu1 }
 0x23c   :  { %v266_v61 = vpop.f32.mrb[6].mxu1 }
 0x23d   :  { %v267_v62 = vpop.f32.mrb[7].mxu1 }
 0x23e   :  { %v2832_v63 = vadd.f32 %v2829_v60, %v267_v62 }
 0x241   :  { %v2565_v0 = vpop.eup %2564 }
 0x242   :  { %380 = vrot.lane.b32.xlu0 %v2565_v0, %s2657_s26  ;;  %v376_v1 = vmul.f32 0.5, %v2565_v0 }
 0x244   :  { %v377_v2 = vadd.f32 0.5, %v376_v1 }
 0x246   :  { %v378_v5 = vmul.f32 0.0, %v377_v2 }
 0x2b4   :  { %v381_v3 = vpop.permute.xlu0 %380 }
 0x2b5   :  { %v383_v4 = vmul.f32 %v381_v3, %v377_v2 }
 0x2b7   :  { %385 = vrot.lane.b32.xlu1 %v383_v4, %s2658_s27 }
 0x329   :  { %v386_v6 = vpop.permute.xlu1 %385 }
 0x32a   :  { %v388_v7 = vadd.f32 %v386_v6, %v378_v5 }
 0x32c   :  { %2566 = vtanh.f32 %v388_v7  ;;  %v479_v24 = vrot.slane %v388_v7, 6 }
 0x336   :  { %v2567_v8 = vpop.eup %2566 }
 0x337   :  { %391 = vrot.lane.b32.xlu0 %v2567_v8, %s2657_s26 }
 0x3a9   :  { %v392_v10 = vpop.permute.xlu0 %391 }
 0x3aa   :  { %v394_v11 = vmul.f32 %v392_v10, %v377_v2 }
 0x3ac   :  { %396 = vrot.lane.b32.xlu1 %v394_v11, %s2658_s27 }
 0x41e   :  { %v397_v12 = vpop.permute.xlu1 %396 }
 0x41f   :  { %2265 = vmatmul.mubr.msk.f32.vlgmr.msra.gmra.mrb[6].mxu0 %vm67_vm0, %v397_v12 }
 0x420   :  { %2468 = vmatpush3.bf16.msra.mxu0 %v2771_v32  ;;  %2286 = vmatprep.mubr.msk.f32.mxu0 %vm2655_vm5, %v2653_v9 }
 0x421   :  { %2469 = vmatprep.subr.bf16.mxu0 %v2654_v17 }
 0x424   :  { %2471 = vmatpush3.bf16.msra.mxu0 %v2787_v40 }
 0x425   :  { %2478 = vmatprep.subr.bf16.mxu0 %v2654_v17 }
 0x4f2   :  { %v466_v13 = vpop.f32.mrb[6].mxu0 }
 0x4f3   :  { %v471_v14 = vrot.slane %v466_v13, 6  ;;  %v2266_v15 = vpop.f32.mrb[7].mxu0 }
 0x4f5   :  { %v473_v16 = vadd.f32 %v471_v14, %v2816_v49 }
 0x4f7   :  { %v474_v18 = vmul.f32 %v473_v16, %v2818_v52 }
 0x4f9   :  { %2568 = vtanh.f32 %v474_v18 }
 0x503   :  { %v2569_v19 = vpop.eup %2568 }
 0x504   :  { %483 = vrot.lane.b32.xlu0 %v2569_v19, %s2657_s26  ;;  %v476_v20 = vmul.f32 0.5, %v2569_v19 }
 0x506   :  { %v477_v21 = vadd.f32 0.5, %v476_v20 }
 0x508   :  { %v481_v25 = vmul.f32 %v479_v24, %v477_v21 }
 0x576   :  { %v484_v22 = vpop.permute.xlu0 %483 }
 0x577   :  { %v486_v23 = vmul.f32 %v484_v22, %v477_v21 }
 0x579   :  { %488 = vrot.lane.b32.xlu1 %v486_v23, %s2658_s27 }
 0x5eb   :  { %v489_v26 = vpop.permute.xlu1 %488 }
 0x5ec   :  { %v491_v27 = vadd.f32 %v489_v26, %v481_v25 }
 0x5ee   :  { %2570 = vtanh.f32 %v491_v27  ;;  %v583_v45 = vrot.slane %v491_v27, 6 }
 0x5f8   :  { %v2571_v28 = vpop.eup %2570 }
 0x5f9   :  { %494 = vrot.lane.b32.xlu0 %v2571_v28, %s2657_s26 }
 0x66b   :  { %v495_v29 = vpop.permute.xlu0 %494 }
 0x66c   :  { %v497_v30 = vmul.f32 %v495_v29, %v477_v21 }
 0x66e   :  { %v499_v31 = vrot.slane %v497_v30, 2 }
 0x670   :  { %500 = vrot.lane.b32.xlu1 %v499_v31, %s2658_s27 }
 0x6e2   :  { %v501_v33 = vpop.permute.xlu1 %500 }
 0x6e3   :  { %2276 = vmatmul.mubr.msk.f32.vlgmr.msra.gmra.mrb[8].mxu1 %vm67_vm0, %v501_v33 }
 0x6e4   :  { %2474 = vmatpush3.bf16.msra.mxu1 %v2771_v32  ;;  %2297 = vmatprep.mubr.msk.f32.mxu1 %vm2655_vm5, %v2653_v9 }
 0x6e5   :  { %2475 = vmatprep.subr.bf16.mxu1 %v2654_v17 }
 0x6e8   :  { %2477 = vmatpush3.bf16.msra.mxu1 %v2787_v40 }
 0x6e9   :  { %2484 = vmatprep.subr.bf16.mxu1 %v2654_v17 }
 0x7b6   :  { %v570_v34 = vpop.f32.mrb[8].mxu1 }
 0x7b7   :  { %v575_v35 = vrot.slane %v570_v34, 4  ;;  %v2277_v36 = vpop.f32.mrb[9].mxu1 }
 0x7b9   :  { %v577_v37 = vadd.f32 %v575_v35, %v2816_v49 }
 0x7bb   :  { %v578_v38 = vmul.f32 %v577_v37, %v2818_v52 }
 0x7bd   :  { %2572 = vtanh.f32 %v578_v38 }
 0x7c7   :  { %v2573_v39 = vpop.eup %2572 }
 0x7c8   :  { %587 = vrot.lane.b32.xlu0 %v2573_v39, %s2657_s26  ;;  %v580_v41 = vmul.f32 0.5, %v2573_v39 }
 0x7ca   :  { %v581_v42 = vadd.f32 0.5, %v580_v41 }
 0x7cc   :  { %v585_v46 = vmul.f32 %v583_v45, %v581_v42 }
 0x83a   :  { %v588_v43 = vpop.permute.xlu0 %587 }
 0x83b   :  { %v590_v44 = vmul.f32 %v588_v43, %v581_v42 }
 0x83d   :  { %592 = vrot.lane.b32.xlu1 %v590_v44, %s2658_s27 }
 0x8af   :  { %v593_v47 = vpop.permute.xlu1 %592 }
 0x8b0   :  { %v595_v48 = vadd.f32 %v593_v47, %v585_v46 }
 0x8b2   :  { %2574 = vtanh.f32 %v595_v48  ;;  %v687_v6 = vrot.slane %v595_v48, 6 }
 0x8bc   :  { %v2575_v50 = vpop.eup %2574 }
 0x8bd   :  { %598 = vrot.lane.b32.xlu0 %v2575_v50, %s2657_s26 }
 0x92f   :  { %v599_v51 = vpop.permute.xlu0 %598 }
 0x930   :  { %v601_v53 = vmul.f32 %v599_v51, %v581_v42 }
 0x932   :  { %v603_v54 = vrot.slane %v601_v53, 4 }
 0x934   :  { %604 = vrot.lane.b32.xlu1 %v603_v54, %s2658_s27 }
 0x9a6   :  { %v605_v55 = vpop.permute.xlu1 %604 }
 0x9a7   :  { %2287 = vmatmul.mubr.msk.f32.vlgmr.msra.gmra.mrb[8].mxu0 %vm67_vm0, %v605_v55 }
 0x9a8   :  { %2480 = vmatpush3.bf16.msra.mxu0 %v2771_v32  ;;  %2308 = vmatprep.mubr.msk.f32.mxu0 %vm2655_vm5, %v2653_v9 }
 0x9a9   :  { %2481 = vmatprep.subr.bf16.mxu0 %v2654_v17 }
 0x9ac   :  { %2483 = vmatpush3.bf16.msra.mxu0 %v2787_v40 }
 0x9ad   :  { %2490 = vmatprep.subr.bf16.mxu0 %v2654_v17 }
 0xa7a   :  { %v674_v57 = vpop.f32.mrb[8].mxu0 }
 0xa7b   :  { %v679_v58 = vrot.slane %v674_v57, 2  ;;  %v2288_v61 = vpop.f32.mrb[9].mxu0 }
 0xa7d   :  { %v681_v62 = vadd.f32 %v679_v58, %v2816_v49 }
 0xa7f   :  { %v682_v0 = vmul.f32 %v681_v62, %v2818_v52 }
 0xa81   :  { %2576 = vtanh.f32 %v682_v0 }
 0xa8b   :  { %v2577_v1 = vpop.eup %2576 }
 0xa8c   :  { %691 = vrot.lane.b32.xlu0 %v2577_v1, %s2657_s26  ;;  %v684_v2 = vmul.f32 0.5, %v2577_v1 }
 0xa8e   :  { %v685_v3 = vadd.f32 0.5, %v684_v2 }
 0xa90   :  { %v689_v7 = vmul.f32 %v687_v6, %v685_v3 }
 0xafe   :  { %v692_v4 = vpop.permute.xlu0 %691 }
 0xaff   :  { %v694_v5 = vmul.f32 %v692_v4, %v685_v3 }
 0xb01   :  { %696 = vrot.lane.b32.xlu1 %v694_v5, %s2658_s27 }
 0xb73   :  { %v697_v8 = vpop.permute.xlu1 %696 }
 0xb74   :  { %v699_v10 = vadd.f32 %v697_v8, %v689_v7 }
 0xb76   :  { %2578 = vtanh.f32 %v699_v10  ;;  %v788_v25 = vrot.slane %v699_v10, 6 }
 0xb80   :  { %v2579_v11 = vpop.eup %2578 }
 0xb81   :  { %702 = vrot.lane.b32.xlu0 %v2579_v11, %s2657_s26 }
 0xbf3   :  { %v703_v49 = vpop.permute.xlu0 %702 }
 0xbf4   :  { %v705_v12 = vmul.f32 %v703_v49, %v685_v3 }
 0xbf6   :  { %v707_v13 = vrot.slane %v705_v12, 6 }
 0xbf8   :  { %708 = vrot.lane.b32.xlu1 %v707_v13, %s2658_s27 }
 0xc6a   :  { %v709_v14 = vpop.permute.xlu1 %708 }
 0xc6b   :  { %2298 = vmatmul.mubr.msk.f32.vlgmr.msra.gmra.mrb[10].mxu1 %vm67_vm0, %v709_v14 }
 0xc6c   :  { %2486 = vmatpush3.bf16.msra.mxu1 %v2771_v32  ;;  %2319 = vmatprep.mubr.msk.f32.mxu1 %vm2655_vm5, %v2653_v9 }
 0xc6d   :  { %2487 = vmatprep.subr.bf16.mxu1 %v2654_v17 }
 0xc70   :  { %2489 = vmatpush3.bf16.msra.mxu1 %v2787_v40 }
 0xc71   :  { %2496 = vmatprep.subr.bf16.mxu1 %v2654_v17 }
 0xd3e   :  { %v778_v15 = vpop.f32.mrb[10].mxu1 }
 0xd3f   :  { %v782_v16 = vadd.f32 %v778_v15, %v2822_v56  ;;  %v2299_v18 = vpop.f32.mrb[11].mxu1 }
 0xd41   :  { %v783_v19 = vmul.f32 %v782_v16, %v2818_v52 }
 0xd43   :  { %2580 = vtanh.f32 %v783_v19 }
 0xd4d   :  { %v2581_v20 = vpop.eup %2580 }
 0xd4e   :  { %792 = vrot.lane.b32.xlu0 %v2581_v20, %s2657_s26  ;;  %v785_v21 = vmul.f32 0.5, %v2581_v20 }
 0xd50   :  { %v786_v22 = vadd.f32 0.5, %v785_v21 }
 0xd52   :  { %v790_v26 = vmul.f32 %v788_v25, %v786_v22 }
 0xdc0   :  { %v793_v23 = vpop.permute.xlu0 %792 }
 0xdc1   :  { %v795_v24 = vmul.f32 %v793_v23, %v786_v22 }
 0xdc3   :  { %797 = vrot.lane.b32.xlu1 %v795_v24, %s2658_s27 }
 0xe35   :  { %v798_v27 = vpop.permute.xlu1 %797 }
 0xe36   :  { %v800_v28 = vadd.f32 %v798_v27, %v790_v26 }
 0xe38   :  { %2582 = vtanh.f32 %v800_v28 }
 0xe42   :  { %v2583_v29 = vpop.eup %2582 }
 0xe43   :  { %803 = vrot.lane.b32.xlu0 %v2583_v29, %s2657_s26  ;;  %v294_v29 = vld [vmem:[%s3081_s5 + $0x10] sm:$0xff] }
 0xeb5   :  { %v804_v30 = vpop.permute.xlu0 %803 }
 0xeb6   :  { %v806_v31 = vmul.f32 %v804_v30, %v786_v22 }
 0xeb8   :  { %808 = vrot.lane.b32.xlu1 %v806_v31, %s2658_s27  ;;  %v295_v31 = vld [vmem:[%s3081_s5 + $0x18] sm:$0xff] }
 0xf2a   :  { %v809_v33 = vpop.permute.xlu1 %808 }
 0xf2b   :  { %2309 = vmatmul.mubr.msk.f32.vlgmr.msra.gmra.mrb[10].mxu0 %vm67_vm0, %v809_v33  ;;  %v2934_v33 = vpack.c.bf16 %v295_v31, %v294_v29 }
 0xf2c   :  { %2492 = vmatpush3.bf16.msra.mxu0 %v2771_v32  ;;  %2330 = vmatprep.mubr.msk.f32.mxu0 %vm2655_vm5, %v2653_v9 }
 0xf2d   :  { %2493 = vmatprep.subr.bf16.mxu0 %v2654_v17 }
 0xf30   :  { %2495 = vmatpush3.bf16.msra.mxu0 %v2787_v40  ;;  %v891_v40 = vrot.slane %v800_v28, 6  ;;  %v293_v28 = vld [vmem:[%s3081_s5 + $0x8] sm:$0xff] }
 0xf31   :  { %2502 = vmatprep.subr.bf16.mxu0 %v2654_v17 }
 0xffe   :  { %v878_v34 = vpop.f32.mrb[10].mxu0 }
 0xfff   :  { %v883_v35 = vrot.slane %v878_v34, 6  ;;  %v2310_v36 = vpop.f32.mrb[11].mxu0 }
0x1001   :  { %v885_v37 = vadd.f32 %v883_v35, %v2822_v56 }
0x1003   :  { %v886_v38 = vmul.f32 %v885_v37, %v2818_v52 }
0x1005   :  { %2584 = vtanh.f32 %v886_v38 }
0x100f   :  { %v2585_v39 = vpop.eup %2584 }
0x1010   :  { %895 = vrot.lane.b32.xlu0 %v2585_v39, %s2657_s26  ;;  %v888_v32 = vmul.f32 0.5, %v2585_v39  ;;  %v2954_v39 = vadd.f32 %v2829_v60, %v2824_v59 }
0x1012   :  { %v889_v41 = vadd.f32 0.5, %v888_v32 }
0x1014   :  { %v893_v44 = vmul.f32 %v891_v40, %v889_v41 }
0x1082   :  { %v896_v42 = vpop.permute.xlu0 %895 }
0x1083   :  { %v898_v43 = vmul.f32 %v896_v42, %v889_v41 }
0x1085   :  { %900 = vrot.lane.b32.xlu1 %v898_v43, %s2658_s27 }
0x10f7   :  { %v901_v45 = vpop.permute.xlu1 %900 }
0x10f8   :  { %v903_v46 = vadd.f32 %v901_v45, %v893_v44 }
0x10fa   :  { %2586 = vtanh.f32 %v903_v46  ;;  %v995_v4 = vrot.slane %v903_v46, 6 }
0x1104   :  { %v2587_v47 = vpop.eup %2586 }
0x1105   :  { %906 = vrot.lane.b32.xlu0 %v2587_v47, %s2657_s26 }
0x1177   :  { %v907_v48 = vpop.permute.xlu0 %906 }
0x1178   :  { %v909_v50 = vmul.f32 %v907_v48, %v889_v41 }
0x117a   :  { %v911_v51 = vrot.slane %v909_v50, 2 }
0x117c   :  { %912 = vrot.lane.b32.xlu1 %v911_v51, %s2658_s27 }
0x11ee   :  { %v913_v53 = vpop.permute.xlu1 %912 }
0x11ef   :  { %2320 = vmatmul.mubr.msk.f32.vlgmr.msra.gmra.mrb[12].mxu1 %vm67_vm0, %v913_v53 }
0x11f0   :  { %2341 = vmatprep.mubr.msk.f32.mxu1 %vm2655_vm5, %v2653_v9 }
0x12c2   :  { %v982_v54 = vpop.f32.mrb[12].mxu1 }
0x12c3   :  { %v987_v55 = vrot.slane %v982_v54, 4  ;;  %v2321_v57 = vpop.f32.mrb[13].mxu1 }
0x12c5   :  { %v989_v58 = vadd.f32 %v987_v55, %v2822_v56 }
0x12c7   :  { %v990_v61 = vmul.f32 %v989_v58, %v2818_v52 }
0x12c9   :  { %2588 = vtanh.f32 %v990_v61 }
0x12d3   :  { %v2589_v62 = vpop.eup %2588 }
0x12d4   :  { %999 = vrot.lane.b32.xlu0 %v2589_v62, %s2657_s26  ;;  %v992_v0 = vmul.f32 0.5, %v2589_v62 }
0x12d6   :  { %v993_v1 = vadd.f32 0.5, %v992_v0 }
0x12d8   :  { %v997_v5 = vmul.f32 %v995_v4, %v993_v1 }
0x1346   :  { %v1000_v2 = vpop.permute.xlu0 %999 }
0x1347   :  { %v1002_v3 = vmul.f32 %v1000_v2, %v993_v1 }
0x1349   :  { %1004 = vrot.lane.b32.xlu1 %v1002_v3, %s2658_s27 }
0x13bb   :  { %v1005_v6 = vpop.permute.xlu1 %1004 }
0x13bc   :  { %v1007_v7 = vadd.f32 %v1005_v6, %v997_v5 }
0x13be   :  { %2590 = vtanh.f32 %v1007_v7  ;;  %v1099_v24 = vrot.slane %v1007_v7, 6 }
0x13c8   :  { %v2591_v8 = vpop.eup %2590 }
0x13c9   :  { %1010 = vrot.lane.b32.xlu0 %v2591_v8, %s2657_s26 }
0x143b   :  { %v1011_v10 = vpop.permute.xlu0 %1010 }
0x143c   :  { %v1013_v11 = vmul.f32 %v1011_v10, %v993_v1 }
0x143e   :  { %v1015_v49 = vrot.slane %v1013_v11, 4 }
0x1440   :  { %1016 = vrot.lane.b32.xlu1 %v1015_v49, %s2658_s27 }
0x14b2   :  { %v1017_v12 = vpop.permute.xlu1 %1016 }
0x14b3   :  { %2331 = vmatmul.mubr.msk.f32.vlgmr.msra.gmra.mrb[12].mxu0 %vm67_vm0, %v1017_v12 }
0x14b4   :  { %2352 = vmatprep.mubr.msk.f32.mxu0 %vm2655_vm5, %v2653_v9 }
0x1586   :  { %v1086_v13 = vpop.f32.mrb[12].mxu0 }
0x1587   :  { %v1091_v14 = vrot.slane %v1086_v13, 2  ;;  %v2332_v15 = vpop.f32.mrb[13].mxu0 }
0x1589   :  { %v1093_v16 = vadd.f32 %v1091_v14, %v2822_v56  ;;  %v292_v56 = vld [vmem:[%s3081_s5] sm:$0xff] }
0x158a   :  { %v2928_v30 = vpack.c.bf16 %v293_v28, %v292_v56 }
0x158b   :  { %v1094_v18 = vmul.f32 %v1093_v16, %v2818_v52 }
0x158c   :  { %2498 = vmatpush3.bf16.msra.mxu1 %v2928_v30  ;;  %2504 = vmatpush3.bf16.msra.mxu0 %v2928_v30 }
0x158d   :  { %2592 = vtanh.f32 %v1094_v18  ;;  %2499 = vmatprep.subr.bf16.mxu1 %v2654_v17  ;;  %2505 = vmatprep.subr.bf16.mxu0 %v2654_v17 }
0x1590   :  { %2501 = vmatpush3.bf16.msra.mxu1 %v2934_v33  ;;  %2507 = vmatpush3.bf16.msra.mxu0 %v2934_v33 }
0x1591   :  { %2508 = vmatprep.subr.bf16.mxu1 %v2654_v17  ;;  %2514 = vmatprep.subr.bf16.mxu0 %v2654_v17 }
0x1597   :  { %v2593_v19 = vpop.eup %2592 }
0x1598   :  { %1103 = vrot.lane.b32.xlu0 %v2593_v19, %s2657_s26  ;;  %v1096_v20 = vmul.f32 0.5, %v2593_v19 }
0x159a   :  { %v1097_v21 = vadd.f32 0.5, %v1096_v20 }
0x159c   :  { %v1101_v25 = vmul.f32 %v1099_v24, %v1097_v21 }
0x160a   :  { %v1104_v22 = vpop.permute.xlu0 %1103 }
0x160b   :  { %v1106_v23 = vmul.f32 %v1104_v22, %v1097_v21 }
0x160d   :  { %1108 = vrot.lane.b32.xlu1 %v1106_v23, %s2658_s27 }
0x167f   :  { %v1109_v26 = vpop.permute.xlu1 %1108 }
0x1680   :  { %v1111_v27 = vadd.f32 %v1109_v26, %v1101_v25 }
0x1682   :  { %2594 = vtanh.f32 %v1111_v27  ;;  %v1200_v48 = vrot.slane %v1111_v27, 6 }
0x168c   :  { %v2595_v34 = vpop.eup %2594 }
0x168d   :  { %1114 = vrot.lane.b32.xlu0 %v2595_v34, %s2657_s26 }
0x16ff   :  { %v1115_v35 = vpop.permute.xlu0 %1114 }
0x1700   :  { %v1117_v36 = vmul.f32 %v1115_v35, %v1097_v21 }
0x1702   :  { %v1119_v37 = vrot.slane %v1117_v36, 6 }
0x1704   :  { %1120 = vrot.lane.b32.xlu1 %v1119_v37, %s2658_s27 }
0x1776   :  { %v1121_v38 = vpop.permute.xlu1 %1120 }
0x1777   :  { %2342 = vmatmul.mubr.msk.f32.vlgmr.msra.gmra.mrb[14].mxu1 %vm67_vm0, %v1121_v38 }
0x1778   :  { %2510 = vmatpush3.bf16.msra.mxu1 %v2928_v30  ;;  %2363 = vmatprep.mubr.msk.f32.mxu1 %vm2655_vm5, %v2653_v9 }
0x1779   :  { %2511 = vmatprep.subr.bf16.mxu1 %v2654_v17 }
0x177c   :  { %2513 = vmatpush3.bf16.msra.mxu1 %v2934_v33 }
0x177d   :  { %2520 = vmatprep.subr.bf16.mxu1 %v2654_v17 }
0x184a   :  { %v1190_v32 = vpop.f32.mrb[14].mxu1 }
0x184b   :  { %v1194_v41 = vadd.f32 %v1190_v32, %v2954_v39  ;;  %v2343_v42 = vpop.f32.mrb[15].mxu1 }
0x184d   :  { %v1195_v43 = vmul.f32 %v1194_v41, %v2818_v52 }
0x184f   :  { %2596 = vtanh.f32 %v1195_v43 }
0x1859   :  { %v2597_v40 = vpop.eup %2596 }
0x185a   :  { %1204 = vrot.lane.b32.xlu0 %v2597_v40, %s2657_s26  ;;  %v1197_v44 = vmul.f32 0.5, %v2597_v40 }
0x185c   :  { %v1198_v45 = vadd.f32 0.5, %v1197_v44 }
0x185e   :  { %v1202_v50 = vmul.f32 %v1200_v48, %v1198_v45 }
0x18cc   :  { %v1205_v46 = vpop.permute.xlu0 %1204 }
0x18cd   :  { %v1207_v47 = vmul.f32 %v1205_v46, %v1198_v45 }
0x18cf   :  { %1209 = vrot.lane.b32.xlu1 %v1207_v47, %s2658_s27 }
0x1941   :  { %v1210_v59 = vpop.permute.xlu1 %1209 }
0x1942   :  { %v1212_v60 = vadd.f32 %v1210_v59, %v1202_v50 }
0x1944   :  { %2598 = vtanh.f32 %v1212_v60  ;;  %v1303_v6 = vrot.slane %v1212_v60, 6 }
0x194e   :  { %v2599_v51 = vpop.eup %2598 }
0x194f   :  { %1215 = vrot.lane.b32.xlu0 %v2599_v51, %s2657_s26 }
0x19c1   :  { %v1216_v53 = vpop.permute.xlu0 %1215 }
0x19c2   :  { %v2961_v54 = vmul.f32 %v1216_v53, %v1198_v45 }
0x19c4   :  { %1220 = vrot.lane.b32.xlu1 %v2961_v54, %s2658_s27  ;;  %v1957_v36 = vrot.slane %v2961_v54, 1 }
0x1a36   :  { %v1221_v55 = vpop.permute.xlu1 %1220 }
0x1a37   :  { %2353 = vmatmul.mubr.msk.f32.vlgmr.msra.gmra.mrb[14].mxu0 %vm67_vm0, %v1221_v55 }
0x1a38   :  { %2516 = vmatpush3.bf16.msra.mxu0 %v2928_v30  ;;  %2374 = vmatprep.mubr.msk.f32.mxu0 %vm2655_vm5, %v2653_v9 }
0x1a39   :  { %2517 = vmatprep.subr.bf16.mxu0 %v2654_v17 }
0x1a3c   :  { %2519 = vmatpush3.bf16.msra.mxu0 %v2934_v33 }
0x1a3d   :  { %2526 = vmatprep.subr.bf16.mxu0 %v2654_v17 }
0x1b0a   :  { %v1290_v57 = vpop.f32.mrb[14].mxu0 }
0x1b0b   :  { %v1295_v58 = vrot.slane %v1290_v57, 6  ;;  %v2354_v61 = vpop.f32.mrb[15].mxu0 }
0x1b0d   :  { %v1297_v62 = vadd.f32 %v1295_v58, %v2954_v39 }
0x1b0f   :  { %v1298_v0 = vmul.f32 %v1297_v62, %v2818_v52 }
0x1b11   :  { %2600 = vtanh.f32 %v1298_v0 }
0x1b1b   :  { %v2601_v1 = vpop.eup %2600 }
0x1b1c   :  { %1307 = vrot.lane.b32.xlu0 %v2601_v1, %s2657_s26  ;;  %v1300_v2 = vmul.f32 0.5, %v2601_v1 }
0x1b1e   :  { %v1301_v3 = vadd.f32 0.5, %v1300_v2 }
0x1b20   :  { %v1305_v7 = vmul.f32 %v1303_v6, %v1301_v3 }
0x1b8e   :  { %v1308_v4 = vpop.permute.xlu0 %1307 }
0x1b8f   :  { %v1310_v5 = vmul.f32 %v1308_v4, %v1301_v3 }
0x1b91   :  { %1312 = vrot.lane.b32.xlu1 %v1310_v5, %s2658_s27 }
0x1c03   :  { %v1313_v8 = vpop.permute.xlu1 %1312 }
0x1c04   :  { %v1315_v10 = vadd.f32 %v1313_v8, %v1305_v7 }
0x1c06   :  { %2602 = vtanh.f32 %v1315_v10  ;;  %v1407_v26 = vrot.slane %v1315_v10, 6 }
0x1c10   :  { %v2603_v11 = vpop.eup %2602 }
0x1c11   :  { %1318 = vrot.lane.b32.xlu0 %v2603_v11, %s2657_s26 }
0x1c83   :  { %v1319_v49 = vpop.permute.xlu0 %1318 }
0x1c84   :  { %v1321_v12 = vmul.f32 %v1319_v49, %v1301_v3 }
0x1c86   :  { %v1323_v13 = vrot.slane %v1321_v12, 2  ;;  %v1942_v31 = vrot.slane %v1321_v12, 1 }
0x1c88   :  { %1324 = vrot.lane.b32.xlu1 %v1323_v13, %s2658_s27  ;;  %v1971_v41 = vsel %vm1970_vm9, %v2961_v54, %v1942_v31  ;;  %v1984_v42 = vsel %vm1970_vm9, %v1957_v36, %v1323_v13 }
0x1cfa   :  { %v1325_v14 = vpop.permute.xlu1 %1324 }
0x1cfb   :  { %2364 = vmatmul.mubr.msk.f32.vlgmr.msra.gmra.mrb[16].mxu1 %vm67_vm0, %v1325_v14 }
0x1cfc   :  { %2522 = vmatpush3.bf16.msra.mxu1 %v2928_v30  ;;  %2385 = vmatprep.mubr.msk.f32.mxu1 %vm2655_vm5, %v2653_v9 }
0x1cfd   :  { %2523 = vmatprep.subr.bf16.mxu1 %v2654_v17 }
0x1d00   :  { %2525 = vmatpush3.bf16.msra.mxu1 %v2934_v33 }
0x1d01   :  { %2532 = vmatprep.subr.bf16.mxu1 %v2654_v17 }
0x1dce   :  { %v1394_v15 = vpop.f32.mrb[16].mxu1 }
0x1dcf   :  { %v1399_v16 = vrot.slane %v1394_v15, 4  ;;  %v2365_v18 = vpop.f32.mrb[17].mxu1 }
0x1dd1   :  { %v1401_v19 = vadd.f32 %v1399_v16, %v2954_v39 }
0x1dd3   :  { %v1402_v20 = vmul.f32 %v1401_v19, %v2818_v52 }
0x1dd5   :  { %2604 = vtanh.f32 %v1402_v20 }
0x1ddf   :  { %v2605_v21 = vpop.eup %2604 }
0x1de0   :  { %1411 = vrot.lane.b32.xlu0 %v2605_v21, %s2657_s26  ;;  %v1404_v22 = vmul.f32 0.5, %v2605_v21 }
0x1de2   :  { %v1405_v23 = vadd.f32 0.5, %v1404_v22 }
0x1de4   :  { %v1409_v27 = vmul.f32 %v1407_v26, %v1405_v23 }
0x1e52   :  { %v1412_v24 = vpop.permute.xlu0 %1411 }
0x1e53   :  { %v1414_v25 = vmul.f32 %v1412_v24, %v1405_v23 }
0x1e55   :  { %1416 = vrot.lane.b32.xlu1 %v1414_v25, %s2658_s27 }
0x1ec7   :  { %v1417_v56 = vpop.permute.xlu1 %1416 }
0x1ec8   :  { %v1419_v28 = vadd.f32 %v1417_v56, %v1409_v27 }
0x1eca   :  { %2606 = vtanh.f32 %v1419_v28  ;;  %v1511_v55 = vrot.slane %v1419_v28, 6 }
0x1ed4   :  { %v2607_v29 = vpop.eup %2606 }
0x1ed5   :  { %1422 = vrot.lane.b32.xlu0 %v2607_v29, %s2657_s26 }
0x1f47   :  { %v1423_v34 = vpop.permute.xlu0 %1422 }
0x1f48   :  { %v1425_v35 = vmul.f32 %v1423_v34, %v1405_v23 }
0x1f4a   :  { %v1944_v37 = vrot.slane %v1425_v35, 2  ;;  %v1960_v38 = vrot.slane %v1425_v35, 3  ;;  %v1427_v32 = vrot.slane %v1425_v35, 4 }
0x1f4c   :  { %v1973_v43 = vsel %vm1972_vm10, %v1971_v41, %v1944_v37  ;;  %v1985_v40 = vsel %vm1972_vm10, %v1984_v42, %v1960_v38  ;;  %1428 = vrot.lane.b32.xlu1 %v1427_v32, %s2658_s27 }
0x1fbe   :  { %v1429_v44 = vpop.permute.xlu1 %1428 }
0x1fbf   :  { %2375 = vmatmul.mubr.msk.f32.vlgmr.msra.gmra.mrb[16].mxu0 %vm67_vm0, %v1429_v44 }
0x1fc0   :  { %2528 = vmatpush3.bf16.msra.mxu0 %v2928_v30  ;;  %2396 = vmatprep.mubr.msk.f32.mxu0 %vm2655_vm5, %v2653_v9 }
0x1fc1   :  { %2529 = vmatprep.subr.bf16.mxu0 %v2654_v17 }
0x1fc4   :  { %2531 = vmatpush3.bf16.msra.mxu0 %v2934_v33 }
0x1fc5   :  { %2538 = vmatprep.subr.bf16.mxu0 %v2654_v17 }
0x2092   :  { %v1498_v45 = vpop.f32.mrb[16].mxu0 }
0x2093   :  { %v1503_v46 = vrot.slane %v1498_v45, 2  ;;  %v2376_v47 = vpop.f32.mrb[17].mxu0 }
0x2095   :  { %v1505_v48 = vadd.f32 %v1503_v46, %v2954_v39 }
0x2097   :  { %v1506_v50 = vmul.f32 %v1505_v48, %v2818_v52 }
0x2099   :  { %2608 = vtanh.f32 %v1506_v50 }
0x20a3   :  { %v2609_v59 = vpop.eup %2608 }
0x20a4   :  { %1515 = vrot.lane.b32.xlu0 %v2609_v59, %s2657_s26  ;;  %v1508_v60 = vmul.f32 0.5, %v2609_v59 }
0x20a6   :  { %v1509_v51 = vadd.f32 0.5, %v1508_v60 }
0x20a8   :  { %v1513_v57 = vmul.f32 %v1511_v55, %v1509_v51 }
0x2116   :  { %v1516_v53 = vpop.permute.xlu0 %1515 }
0x2117   :  { %v1518_v54 = vmul.f32 %v1516_v53, %v1509_v51 }
0x2119   :  { %1520 = vrot.lane.b32.xlu1 %v1518_v54, %s2658_s27 }
0x218b   :  { %v1521_v58 = vpop.permute.xlu1 %1520 }
0x218c   :  { %v1523_v61 = vadd.f32 %v1521_v58, %v1513_v57 }
0x218e   :  { %2610 = vtanh.f32 %v1523_v61  ;;  %v1612_v16 = vrot.slane %v1523_v61, 6 }
0x2198   :  { %v2611_v62 = vpop.eup %2610 }
0x2199   :  { %1526 = vrot.lane.b32.xlu0 %v2611_v62, %s2657_s26 }
0x220b   :  { %v1527_v39 = vpop.permute.xlu0 %1526 }
0x220c   :  { %v1529_v0 = vmul.f32 %v1527_v39, %v1509_v51 }
0x220e   :  { %v1946_v1 = vrot.slane %v1529_v0, 3  ;;  %v1962_v2 = vrot.slane %v1529_v0, 4  ;;  %v1531_v3 = vrot.slane %v1529_v0, 6 }
0x2210   :  { %v1975_v4 = vsel %vm1974_vm11, %v1973_v43, %v1946_v1  ;;  %v1986_v5 = vsel %vm1974_vm11, %v1985_v40, %v1962_v2  ;;  %1532 = vrot.lane.b32.xlu1 %v1531_v3, %s2658_s27 }
0x2282   :  { %v1533_v6 = vpop.permute.xlu1 %1532 }
0x2283   :  { %2386 = vmatmul.mubr.msk.f32.vlgmr.msra.gmra.mrb[18].mxu1 %vm67_vm0, %v1533_v6 }
0x2284   :  { %2534 = vmatpush3.bf16.msra.mxu1 %v2928_v30  ;;  %2407 = vmatprep.mubr.msk.f32.mxu1 %vm2655_vm5, %v2653_v9 }
0x2285   :  { %2535 = vmatprep.subr.bf16.mxu1 %v2654_v17 }
0x2288   :  { %2537 = vmatpush3.bf16.msra.mxu1 %v2934_v33 }
0x2356   :  { %v1602_v7 = vpop.f32.mrb[18].mxu1 }
0x2357   :  { %v1606_v8 = vadd.f32 %v1602_v7, %v2832_v63  ;;  %v2387_v10 = vpop.f32.mrb[19].mxu1 }
0x2359   :  { %v1607_v11 = vmul.f32 %v1606_v8, %v2818_v52 }
0x235b   :  { %2612 = vtanh.f32 %v1607_v11 }
0x2365   :  { %v2613_v49 = vpop.eup %2612 }
0x2366   :  { %1616 = vrot.lane.b32.xlu0 %v2613_v49, %s2657_s26  ;;  %v1609_v12 = vmul.f32 0.5, %v2613_v49 }
0x2368   :  { %v1610_v13 = vadd.f32 0.5, %v1609_v12 }
0x236a   :  { %v1614_v18 = vmul.f32 %v1612_v16, %v1610_v13 }
0x23d8   :  { %v1617_v14 = vpop.permute.xlu0 %1616 }
0x23d9   :  { %v1619_v15 = vmul.f32 %v1617_v14, %v1610_v13 }
0x23db   :  { %1621 = vrot.lane.b32.xlu1 %v1619_v15, %s2658_s27 }
0x244d   :  { %v1622_v19 = vpop.permute.xlu1 %1621 }
0x244e   :  { %v1624_v20 = vadd.f32 %v1622_v19, %v1614_v18 }
0x2450   :  { %2614 = vtanh.f32 %v1624_v20 }
0x245a   :  { %v2615_v21 = vpop.eup %2614 }
0x245b   :  { %1627 = vrot.lane.b32.xlu0 %v2615_v21, %s2657_s26 }
0x24cd   :  { %v1628_v22 = vpop.permute.xlu0 %1627 }
0x24ce   :  { %v1630_v23 = vmul.f32 %v1628_v22, %v1610_v13 }
0x24d0   :  { %v1948_v24 = vrot.slane %v1630_v23, 4  ;;  %v1964_v25 = vrot.slane %v1630_v23, 5  ;;  %1632 = vrot.lane.b32.xlu1 %v1630_v23, %s2658_s27 }
0x24d2   :  { %v1987_v26 = vsel %vm1976_vm12, %v1986_v5, %v1964_v25  ;;  %v1977_v27 = vsel %vm1976_vm12, %v1975_v4, %v1948_v24 }
0x2542   :  { %v1633_v56 = vpop.permute.xlu1 %1632 }
0x2543   :  { %2397 = vmatmul.mubr.msk.f32.vlgmr.msra.gmra.mrb[18].mxu0 %vm67_vm0, %v1633_v56 }
0x2544   :  { %2540 = vmatpush3.bf16.msra.mxu0 %v2928_v30  ;;  %2418 = vmatprep.mubr.msk.f32.mxu0 %vm2655_vm5, %v2653_v9  ;;  %v1715_v9 = vrot.slane %v1624_v20, 6 }
0x2545   :  { %2541 = vmatprep.subr.bf16.mxu0 %v2654_v17 }
0x2548   :  { %2543 = vmatpush3.bf16.msra.mxu0 %v2934_v33 }
0x2616   :  { %v1702_v28 = vpop.f32.mrb[18].mxu0 }
0x2617   :  { %v1707_v29 = vrot.slane %v1702_v28, 6  ;;  %v2398_v31 = vpop.f32.mrb[19].mxu0  ;;  %v1994_v28 = vld [vmem:[%s3083_s7 + $0x18] sm:$0xff] }
0x2619   :  { %v1709_v34 = vadd.f32 %v1707_v29, %v2832_v63 }
0x261b   :  { %v1710_v35 = vmul.f32 %v1709_v34, %v2818_v52 }
0x261d   :  { %2616 = vtanh.f32 %v1710_v35 }
0x2627   :  { %v2617_v36 = vpop.eup %2616 }
0x2628   :  { %1719 = vrot.lane.b32.xlu0 %v2617_v36, %s2657_s26  ;;  %v1712_v37 = vmul.f32 0.5, %v2617_v36 }
0x262a   :  { %v1713_v30 = vadd.f32 0.5, %v1712_v37 }
0x262c   :  { %v1717_v17 = vmul.f32 %v1715_v9, %v1713_v30  ;;  %v2134_v9 = vld [vmem:[%s3084_s8] ss:$0 sm:$0xff] }
0x269a   :  { %v1720_v38 = vpop.permute.xlu0 %1719 }
0x269b   :  { %v1722_v32 = vmul.f32 %v1720_v38, %v1713_v30 }
0x269d   :  { %1724 = vrot.lane.b32.xlu1 %v1722_v32, %s2658_s27 }
0x270f   :  { %v1725_v33 = vpop.permute.xlu1 %1724 }
0x2710   :  { %v1727_v41 = vadd.f32 %v1725_v33, %v1717_v17 }
0x2712   :  { %2618 = vtanh.f32 %v1727_v41  ;;  %v1819_v39 = vrot.slane %v1727_v41, 6 }
0x271c   :  { %v2619_v42 = vpop.eup %2618 }
0x271d   :  { %1730 = vrot.lane.b32.xlu0 %v2619_v42, %s2657_s26 }
0x278f   :  { %v1731_v43 = vpop.permute.xlu0 %1730 }
0x2790   :  { %v1733_v40 = vmul.f32 %v1731_v43, %v1713_v30 }
0x2792   :  { %v1950_v44 = vrot.slane %v1733_v40, 5  ;;  %v1966_v45 = vrot.slane %v1733_v40, 6  ;;  %v1735_v46 = vrot.slane %v1733_v40, 2 }
0x2794   :  { %1736 = vrot.lane.b32.xlu1 %v1735_v46, %s2658_s27  ;;  %v1988_v47 = vsel %vm1978_vm13, %v1987_v26, %v1966_v45  ;;  %v1979_v48 = vsel %vm1978_vm13, %v1977_v27, %v1950_v44  ;;  %v1993_v27 = vld [vmem:[%s3083_s7 + $0x10] sm:$0xff] }
0x2795   :  { %v2548_v29 = vpack.c.bf16 %v1994_v28, %v1993_v27 }
0x2806   :  { %v1737_v50 = vpop.permute.xlu1 %1736 }
0x2807   :  { %2408 = vmatmul.mubr.msk.f32.vlgmr.msra.gmra.mrb[20].mxu1 %vm67_vm0, %v1737_v50 }
0x28da   :  { %v1806_v59 = vpop.f32.mrb[20].mxu1 }
0x28db   :  { %v1811_v60 = vrot.slane %v1806_v59, 4  ;;  %v2409_v51 = vpop.f32.mrb[21].mxu1 }
0x28dd   :  { %v1813_v53 = vadd.f32 %v1811_v60, %v2832_v63 }
0x28df   :  { %v1814_v54 = vmul.f32 %v1813_v53, %v2818_v52 }
0x28e1   :  { %2620 = vtanh.f32 %v1814_v54 }
0x28eb   :  { %v2621_v55 = vpop.eup %2620 }
0x28ec   :  { %1823 = vrot.lane.b32.xlu0 %v2621_v55, %s2657_s26  ;;  %v1816_v57 = vmul.f32 0.5, %v2621_v55 }
0x28ee   :  { %v1817_v58 = vadd.f32 0.5, %v1816_v57 }
0x28f0   :  { %v1821_v0 = vmul.f32 %v1819_v39, %v1817_v58 }
0x295e   :  { %v1824_v61 = vpop.permute.xlu0 %1823 }
0x295f   :  { %v1826_v62 = vmul.f32 %v1824_v61, %v1817_v58 }
0x2961   :  { %1828 = vrot.lane.b32.xlu1 %v1826_v62, %s2658_s27 }
0x29d3   :  { %v1829_v1 = vpop.permute.xlu1 %1828 }
0x29d4   :  { %v1831_v2 = vadd.f32 %v1829_v1, %v1821_v0 }
0x29d6   :  { %2622 = vtanh.f32 %v1831_v2  ;;  %v1923_v23 = vrot.slane %v1831_v2, 6 }
0x29e0   :  { %v2623_v3 = vpop.eup %2622 }
0x29e1   :  { %1834 = vrot.lane.b32.xlu0 %v2623_v3, %s2657_s26 }
0x2a53   :  { %v1835_v4 = vpop.permute.xlu0 %1834 }
0x2a54   :  { %v1837_v5 = vmul.f32 %v1835_v4, %v1817_v58 }
0x2a56   :  { %v1952_v6 = vrot.slane %v1837_v5, 6  ;;  %v1968_v7 = vrot.slane %v1837_v5, 7  ;;  %v1839_v8 = vrot.slane %v1837_v5, 4 }
0x2a58   :  { %1840 = vrot.lane.b32.xlu1 %v1839_v8, %s2658_s27  ;;  %v1989_v10 = vsel %vm1980_vm14, %v1988_v47, %v1968_v7  ;;  %v1981_v11 = vsel %vm1980_vm14, %v1979_v48, %v1952_v6 }
0x2aca   :  { %v1841_v49 = vpop.permute.xlu1 %1840 }
0x2acb   :  { %2419 = vmatmul.mubr.msk.f32.vlgmr.msra.gmra.mrb[20].mxu0 %vm67_vm0, %v1841_v49 }
0x2b9e   :  { %v1910_v12 = vpop.f32.mrb[20].mxu0 }
0x2b9f   :  { %v1915_v13 = vrot.slane %v1910_v12, 2  ;;  %v2420_v14 = vpop.f32.mrb[21].mxu0 }
0x2ba1   :  { %v1917_v15 = vadd.f32 %v1915_v13, %v2832_v63  ;;  %v1991_v63 = vld [vmem:[%s3083_s7] sm:$0xff] }
0x2ba3   :  { %v1918_v16 = vmul.f32 %v1917_v15, %v2818_v52  ;;  %v1992_v52 = vld [vmem:[%s3083_s7 + $0x8] sm:$0xff] }
0x2ba4   :  { %v2544_v56 = vpack.c.bf16 %v1992_v52, %v1991_v63 }
0x2ba5   :  { %2624 = vtanh.f32 %v1918_v16 }
0x2ba6   :  { %2545 = vmatprep.subr.bf16.mxu1 %v2544_v56 }
0x2ba7   :  { %2547 = vmatpush3.bf16.msra.mxu1 %v2544_v56 }
0x2ba8   :  { %2549 = vmatprep.subr.bf16.mxu1 %v2548_v29 }
0x2bab   :  { %2551 = vmatpush3.bf16.msra.mxu1 %v2548_v29 }
0x2baf   :  { %v2625_v18 = vpop.eup %2624 }
0x2bb0   :  { %1927 = vrot.lane.b32.xlu0 %v2625_v18, %s2657_s26  ;;  %v1920_v19 = vmul.f32 0.5, %v2625_v18 }
0x2bb2   :  { %v1921_v20 = vadd.f32 0.5, %v1920_v19 }
0x2bb4   :  { %v1925_v24 = vmul.f32 %v1923_v23, %v1921_v20 }
0x2c22   :  { %v1928_v21 = vpop.permute.xlu0 %1927 }
0x2c23   :  { %v1930_v22 = vmul.f32 %v1928_v21, %v1921_v20 }
0x2c25   :  { %1932 = vrot.lane.b32.xlu1 %v1930_v22, %s2658_s27 }
0x2c97   :  { %v1933_v25 = vpop.permute.xlu1 %1932 }
0x2c98   :  { %v1935_v26 = vadd.f32 %v1933_v25, %v1925_v24 }
0x2c9a   :  { %2626 = vtanh.f32 %v1935_v26 }
0x2ca4   :  { %v2627_v31 = vpop.eup %2626 }
0x2ca5   :  { %1938 = vrot.lane.b32.xlu0 %v2627_v31, %s2657_s26 }
0x2d17   :  { %v1939_v34 = vpop.permute.xlu0 %1938 }
0x2d18   :  { %v1941_v35 = vmul.f32 %v1939_v34, %v1921_v20 }
0x2d1a   :  { %v1955_v36 = vrot.slane %v1941_v35, 7  ;;  %v1990_v37 = vsel %vm1982_vm15, %v1989_v10, %v1941_v35 }
0x2d1b   :  { %2006 = vrot.lane.b32.xlu0 %v1990_v37, %s2658_s27 }
0x2d1c   :  { %v1983_v30 = vsel %vm1982_vm15, %v1981_v11, %v1955_v36 }
0x2d1d   :  { %2004 = vrot.lane.b32.xlu1 %v1983_v30, %s2658_s27 }
0x2d8d   :  { %v2007_v32 = vpop.permute.xlu0 %2006 }
0x2d8f   :  { %v2005_v38 = vpop.permute.xlu1 %2004 }
0x2d90   :  { %2429 = vmatprep.mubr.msk.f32.mxu1 %vm67_vm0, %v2005_v38 }
0x2d91   :  { %2430 = vmatmul.mubr.msk.f32.vlgmr.msra.gmra.mrb[22].mxu1 %vm67_vm0, %v2007_v32 }
0x2e64   :  { %v2431_v17 = vpop.f32.mrb[22].mxu1 }
0x2e65   :  { %v2084_v33 = vadd.f32 %v2431_v17, %v2134_v9  ;;  %v2078_v41 = vpop.f32.mrb[23].mxu1 }
0x2e66   :  { %v2079_v42 = vadd.f32 %v2134_v9, %v2078_v41 }
0x2e67   :  { %2088 = vst.msk [vmem:[#allocation2 + $0x8] sm:$0xff] %vm67_vm0, %v2084_v33 }
0x2e68   :  { %2087 = vst.msk [vmem:[#allocation2] sm:$0xff] %vm67_vm0, %v2079_v42 }
0x2e69   :  { %2639 = shalt.err (!%p2636_p4)
}
0x2e6a   :  { %s2640_s23 = scalar_lea.hbm %s3085_s9, 256 }
0x2e6b   :  { %p2641_p5 = scmp.ne.s32.totalorder %s3085_s9, %s2640_s23  ;;  %p2644_p6 = scmp.lt.u32.totalorder %s2640_s23, %s3085_s9 }
0x2e6d   :  { %p2646_p7 = pnand %p2644_p6, %p2641_p5 }
0x2e6f   :  { %2649 = shalt.err (!%p2646_p7)
}
0x2e70   :  { %s2660_s26 = smov 128   ;;  %s2661_s27 = smov 8  }
0x2e71   :  { %2100 = dma.vmem_to_hbm [thread:$0]  %s2095_s2, 256, %s3085_s9, [#allocation3], %s2660_s26, %s2660_s26, %s2661_s27  }
0x2e72   :  { %2650 = dma.done.wait [#allocation3], 256  }
0x2e73   :  { %2651 = vsyncadd [#allocation3], 4294967040 }
0x2e74   :  { %2104 = vsyncpa [#allocation3], 1 }

</bundles_post_ra>
